<compile_context>
chip_gen: v6e
topology: v6e:2x2x1
jax: 0.10.0
libtpu: 0.0.40
codegen_flags: <defaults>
</compile_context>

<pallas_src>
import math

import jax
import jax.numpy as jnp
from jax.experimental import pallas as pl
from jax.experimental.pallas import tpu as pltpu

# ---- model dimensions (small, consistent with the module's forward) -------
B, S = 2, 8               # batch, sequence length
HIDDEN = 32               # args.hidden_size
N_HEADS = 2
HEAD_DIM = HIDDEN // N_HEADS
INTERMEDIATE = 64
N_LAYERS = 2
VOCAB = 64
TYPE_VOCAB = 2
MAX_POS = 32
NUM_LABELS = 2            # args.num_labels
OUT_PAD = 128             # lane-dense padded width for the fused head output
OUT_ROWS = 8              # sublane-dense padded batch rows for the output
N_TBL_ROWS = VOCAB + MAX_POS + TYPE_VOCAB

# Row indices inside the per-layer packed vector blob (N_LAYERS, 8, 128).
ROW_BQKV, ROW_BO, ROW_LN1G, ROW_LN1B, ROW_BI, ROW_BF, ROW_LN2G, ROW_LN2B = range(8)
# Row indices inside the misc packed vector blob (8, 128).
ROW_ELN_G, ROW_ELN_B, ROW_POOL_B, ROW_HEADS_B = range(4)


def _vspec():
    return pl.BlockSpec(memory_space=pltpu.MemorySpace.VMEM)


def _sspec():
    return pl.BlockSpec(memory_space=pltpu.MemorySpace.SMEM)


def _ln(x, g, b, eps=1e-12):
    mu = jnp.mean(x, axis=-1, keepdims=True)
    var = jnp.mean((x - mu) ** 2, axis=-1, keepdims=True)
    return (x - mu) * jax.lax.rsqrt(var + eps) * g + b


# ---------------------------------------------------------------------------
# Fused kernel: gather+LN -> 2 x transformer layer -> pooler -> fused heads
# ---------------------------------------------------------------------------
def dann_fused_kernel(ids_ref, mask_ref, tbl_ref,
                      wqkv_ref, wo_ref, wi_ref, wf_ref,
                      lvec_ref, mvec_ref,
                      pool_w_ref, heads_w_ref,
                      out_ref, emb_sc):
    # ---- Embedding gather (word + position + type), fused in-kernel -------
    # ids_ref (SMEM int32, shape (2, B*S)): row 0 = input_ids, row 1 = type ids.
    # tbl_ref (VMEM f32, shape (N_TBL_ROWS, 1, H)): word | pos | type tables.
    for b in range(B):
        for s in range(S):
            j = b * S + s
            tok = ids_ref[0, j]
            typ = ids_ref[1, j]
            row = (tbl_ref[tok]                                 # word  (1, H)
                   + tbl_ref[VOCAB + s]                         # pos   (static)
                   + tbl_ref[VOCAB + MAX_POS + typ])            # type
            emb_sc[pl.ds(j, 1), :] = row

    mvec = mvec_ref[...]                                        # (8, 128)
    h = _ln(emb_sc[...].reshape(B, S, HIDDEN),
            mvec[ROW_ELN_G:ROW_ELN_G + 1, :HIDDEN],
            mvec[ROW_ELN_B:ROW_ELN_B + 1, :HIDDEN])             # (B, S, H)

    # Additive attention mask, computed once and broadcast once to the
    # head-batched scores shape (N_HEADS*B, S, S); batch index = h*B + b.
    add_mask = (1.0 - mask_ref[...]) * (-1e9)                   # (B, S)
    mask_b = jnp.broadcast_to(add_mask.reshape(B, 1, S), (B, S, S))
    mask_nb = jnp.concatenate([mask_b] * N_HEADS, axis=0)       # (N_HEADS*B,S,S)

    # Statically unrolled transformer layers.
    for l in range(N_LAYERS):
        lv = lvec_ref[l]                                        # (8, 128)
        x2 = h.reshape(B * S, HIDDEN)

        # Fused QKV projection: one MXU push (scale folded into W_q).
        qkv = (jnp.dot(x2, wqkv_ref[l], preferred_element_type=jnp.float32)
               + lv[ROW_BQKV:ROW_BQKV + 1, :3 * HIDDEN])        # (B*S, 3H)
        q2 = qkv[:, 0 * HIDDEN:1 * HIDDEN].reshape(B, S, HIDDEN)
        k2 = qkv[:, 1 * HIDDEN:2 * HIDDEN].reshape(B, S, HIDDEN)
        v2 = qkv[:, 2 * HIDDEN:3 * HIDDEN].reshape(B, S, HIDDEN)

        # Head-batched attention: fold heads into the leading batch axis so
        # scores/contexts are ONE batched einsum each (no per-head loop, no
        # per-head W_O matmul).  Batch index = h*B + b.
        qh = jnp.concatenate([q2[:, :, hd * HEAD_DIM:(hd + 1) * HEAD_DIM]
                              for hd in range(N_HEADS)], axis=0)
        kh = jnp.concatenate([k2[:, :, hd * HEAD_DIM:(hd + 1) * HEAD_DIM]
                              for hd in range(N_HEADS)], axis=0)
        vh = jnp.concatenate([v2[:, :, hd * HEAD_DIM:(hd + 1) * HEAD_DIM]
                              for hd in range(N_HEADS)], axis=0)

        sc = jnp.einsum('nqd,nkd->nqk', qh, kh,
                        preferred_element_type=jnp.float32) + mask_nb
        sc = sc - jnp.max(sc, axis=-1, keepdims=True)
        p = jnp.exp(sc)
        p = p * pl.reciprocal(jnp.sum(p, axis=-1, keepdims=True), approx=True)
        ctx = jnp.einsum('nqk,nkd->nqd', p, vh,
                         preferred_element_type=jnp.float32)    # (N_HEADS*B,S,dh)

        # Re-pack heads into lanes and run a SINGLE W_O matmul.
        ctx_full = jnp.concatenate([ctx[hd * B:(hd + 1) * B]
                                    for hd in range(N_HEADS)], axis=-1)
        attn = (jnp.dot(ctx_full.reshape(B * S, HIDDEN), wo_ref[l],
                        preferred_element_type=jnp.float32)
                + lv[ROW_BO:ROW_BO + 1, :HIDDEN]).reshape(B, S, HIDDEN)
        h = _ln(h + attn,
                lv[ROW_LN1G:ROW_LN1G + 1, :HIDDEN],
                lv[ROW_LN1B:ROW_LN1B + 1, :HIDDEN])

        # Feed-forward block.
        inter = (jnp.dot(h.reshape(B * S, HIDDEN), wi_ref[l],
                         preferred_element_type=jnp.float32)
                 + lv[ROW_BI:ROW_BI + 1, :INTERMEDIATE])
        # TODO(synk): HF BERT default is exact (erf) GELU; tanh approximation
        # used here for robust Mosaic lowering (tiny numeric drift).
        inter = jax.nn.gelu(inter, approximate=True)
        ffn = (jnp.dot(inter, wf_ref[l],
                       preferred_element_type=jnp.float32)
               + lv[ROW_BF:ROW_BF + 1, :HIDDEN]).reshape(B, S, HIDDEN)
        h = _ln(h + ffn,
                lv[ROW_LN2G:ROW_LN2G + 1, :HIDDEN],
                lv[ROW_LN2B:ROW_LN2B + 1, :HIDDEN])

    # Pooler: tanh(W_pool @ hidden[:, 0]).
    first = h[:, 0, :]                                          # (B, H)
    pooled = jnp.tanh(
        jnp.dot(first, pool_w_ref[...], preferred_element_type=jnp.float32)
        + mvec[ROW_POOL_B:ROW_POOL_B + 1, :HIDDEN])
    # self.dropout(pooled_output): identity in eval mode.
    # GradientReversalFn.apply: identity in the forward pass.
    # Fused sentiment|domain heads, zero-padded to 128 lanes; batch padded to
    # 8 sublane rows so the single output store is a full unmasked (8,128) tile.
    logits = (jnp.dot(pooled, heads_w_ref[...],
                      preferred_element_type=jnp.float32)
              + mvec[ROW_HEADS_B:ROW_HEADS_B + 1, :OUT_PAD])    # (B, 128)
    out_ref[...] = jnp.concatenate(
        [logits, jnp.zeros((OUT_ROWS - B, OUT_PAD), jnp.float32)], axis=0)


# ---------------------------------------------------------------------------
# Forward pass (mirrors DomainAdaptationModel.forward)
# ---------------------------------------------------------------------------
def dann_forward(params, input_ids, attention_mask, token_type_ids,
                 grl_lambda=1.0):
    del grl_lambda  # GRL forward is identity; lambda only scales gradients

    ids = jnp.stack([input_ids.reshape(B * S),
                     token_type_ids.reshape(B * S)]).astype(jnp.int32)  # (2,16)

    args = (ids, attention_mask.astype(jnp.float32),
            params['emb_tbl'],
            params['wqkv'], params['wo'], params['wi'], params['wf'],
            params['layer_vecs'], params['misc_vecs'],
            params['pool_w'], params['heads_w'])

    out = pl.pallas_call(
        dann_fused_kernel,
        out_shape=jax.ShapeDtypeStruct((OUT_ROWS, OUT_PAD), jnp.float32),
        in_specs=[_sspec()] + [_vspec()] * (len(args) - 1),
        out_specs=_vspec(),
        scratch_shapes=[pltpu.VMEM((B * S, HIDDEN), jnp.float32)],
    )(*args)

    sentiment_pred = out[:B, :NUM_LABELS]
    domain_pred = out[:B, NUM_LABELS:2 * NUM_LABELS]
    return sentiment_pred, domain_pred


dann_forward_jit = jax.jit(dann_forward)


# ---------------------------------------------------------------------------
# Deterministic parameter construction (synthetic, no checkpoint loading)
# ---------------------------------------------------------------------------
def _pack_rows(rows, n_rows=8, width=128):
    """Pack a list of 1-D vectors into one lane-padded (n_rows, width) blob."""
    blob = jnp.zeros((n_rows, width), jnp.float32)
    for i, r in enumerate(rows):
        blob = blob.at[i, :r.shape[0]].set(r.astype(jnp.float32))
    return blob


def init_params(key):
    def nrm(k, shape):
        return 0.02 * jax.random.normal(k, shape, jnp.float32)

    keys = iter(jax.random.split(key, 64))
    scale = 1.0 / math.sqrt(HEAD_DIM)

    # Packed embedding table: [word | position | type], one VMEM operand,
    # rows gathered in-kernel via dynamic first-axis indexing.
    word_emb = nrm(next(keys), (VOCAB, HIDDEN))
    pos_emb = nrm(next(keys), (MAX_POS, HIDDEN))
    type_emb = nrm(next(keys), (TYPE_VOCAB, HIDDEN))
    emb_tbl = jnp.concatenate([word_emb, pos_emb, type_emb], axis=0)
    emb_tbl = emb_tbl.reshape(N_TBL_ROWS, 1, HIDDEN)

    wqkv_l, wo_l, wi_l, wf_l, lvec_l = [], [], [], [], []
    for _ in range(N_LAYERS):
        # Fold the 1/sqrt(head_dim) attention scale into the Q weights.
        wq = nrm(next(keys), (HIDDEN, HIDDEN)) * scale
        wk = nrm(next(keys), (HIDDEN, HIDDEN))
        wv = nrm(next(keys), (HIDDEN, HIDDEN))
        wqkv_l.append(jnp.concatenate([wq, wk, wv], axis=1))     # (H, 3H)
        wo_l.append(nrm(next(keys), (HIDDEN, HIDDEN)))
        wi_l.append(nrm(next(keys), (HIDDEN, INTERMEDIATE)))
        wf_l.append(nrm(next(keys), (INTERMEDIATE, HIDDEN)))
        # All per-layer biases / LN params packed into one (8,128) blob.
        lvec_l.append(_pack_rows([
            jnp.zeros((3 * HIDDEN,), jnp.float32),    # ROW_BQKV
            jnp.zeros((HIDDEN,), jnp.float32),        # ROW_BO
            jnp.ones((HIDDEN,), jnp.float32),         # ROW_LN1G
            jnp.zeros((HIDDEN,), jnp.float32),        # ROW_LN1B
            jnp.zeros((INTERMEDIATE,), jnp.float32),  # ROW_BI
            jnp.zeros((HIDDEN,), jnp.float32),        # ROW_BF
            jnp.ones((HIDDEN,), jnp.float32),         # ROW_LN2G
            jnp.zeros((HIDDEN,), jnp.float32),        # ROW_LN2B
        ]))

    # Fused sentiment|domain classifier, zero-padded to 128 output lanes.
    sent_w = nrm(next(keys), (HIDDEN, NUM_LABELS))
    dom_w = nrm(next(keys), (HIDDEN, NUM_LABELS))
    heads_w = jnp.zeros((HIDDEN, OUT_PAD), jnp.float32)
    heads_w = heads_w.at[:, :NUM_LABELS].set(sent_w)
    heads_w = heads_w.at[:, NUM_LABELS:2 * NUM_LABELS].set(dom_w)

    misc_vecs = _pack_rows([
        jnp.ones((HIDDEN,), jnp.float32),     # ROW_ELN_G
        jnp.zeros((HIDDEN,), jnp.float32),    # ROW_ELN_B
        jnp.zeros((HIDDEN,), jnp.float32),    # ROW_POOL_B
        jnp.zeros((OUT_PAD,), jnp.float32),   # ROW_HEADS_B (already padded)
    ])

    return {
        'emb_tbl': emb_tbl,
        'wqkv': jnp.stack(wqkv_l), 'wo': jnp.stack(wo_l),
        'wi': jnp.stack(wi_l), 'wf': jnp.stack(wf_l),
        'layer_vecs': jnp.stack(lvec_l),
        'misc_vecs': misc_vecs,
        'pool_w': nrm(next(keys), (HIDDEN, HIDDEN)),
        'heads_w': heads_w,
    }


if __name__ == "__main__":
    root = jax.random.PRNGKey(0)
    k_params, k_ids = jax.random.split(root)
    params = init_params(k_params)

    input_ids = jax.random.randint(k_ids, (B, S), 0, VOCAB, dtype=jnp.int32)
    attention_mask = jnp.ones((B, S), jnp.float32)
    token_type_ids = jnp.zeros((B, S), jnp.int32)

    # TODO(synk): pretrained BERT weights (AutoModel.from_pretrained) cannot
    # be reproduced; a deterministic synthetic encoder of the same structure
    # is used instead.
    sentiment_pred, domain_pred = dann_forward_jit(
        params, input_ids, attention_mask, token_type_ids, grl_lambda=1.0)
    jax.block_until_ready((sentiment_pred, domain_pred))

    assert sentiment_pred.shape == (B, NUM_LABELS)
    assert domain_pred.shape == (B, NUM_LABELS)
    assert bool(jnp.all(jnp.isfinite(sentiment_pred)))
    assert bool(jnp.all(jnp.isfinite(domain_pred)))
    print("KERNEL_OK")
</pallas_src>

<mosaic_0001>
module attributes {stable_mosaic.version = 11 : i64} {
  func.func @dann_fused_kernel(%arg0: memref<2x16xi32, #tpu.memory_space<smem>>, %arg1: memref<2x8xf32, #tpu.memory_space<vmem>>, %arg2: memref<98x1x32xf32, #tpu.memory_space<vmem>>, %arg3: memref<2x32x96xf32, #tpu.memory_space<vmem>>, %arg4: memref<2x32x32xf32, #tpu.memory_space<vmem>>, %arg5: memref<2x32x64xf32, #tpu.memory_space<vmem>>, %arg6: memref<2x64x32xf32, #tpu.memory_space<vmem>>, %arg7: memref<2x8x128xf32, #tpu.memory_space<vmem>>, %arg8: memref<8x128xf32, #tpu.memory_space<vmem>>, %arg9: memref<32x32xf32, #tpu.memory_space<vmem>>, %arg10: memref<32x128xf32, #tpu.memory_space<vmem>>, %arg11: memref<8x128xf32, #tpu.memory_space<vmem>>, %arg12: memref<16x32xf32, #tpu.memory_space<vmem>>) attributes {dimension_semantics = [], scalar_prefetch = 0 : i64, scratch_operands = 1 : i64, tpu.core_type = #tpu.core_type<tc>} {
    %c0 = arith.constant 0 : index
    %c0_0 = arith.constant 0 : index
    %0 = memref.load %arg0[%c0, %c0_0] : memref<2x16xi32, #tpu.memory_space<smem>>
    %c1 = arith.constant 1 : index
    %c0_1 = arith.constant 0 : index
    %1 = memref.load %arg0[%c1, %c0_1] : memref<2x16xi32, #tpu.memory_space<smem>>
    %2 = arith.index_cast %0 : i32 to index
    %c0_2 = arith.constant 0 : index
    %c0_3 = arith.constant 0 : index
    %3 = vector.load %arg2[%2, %c0_2, %c0_3] : memref<98x1x32xf32, #tpu.memory_space<vmem>>, vector<1x1x32xf32>
    %4 = vector.shape_cast %3 : vector<1x1x32xf32> to vector<1x32xf32>
    %c64 = arith.constant 64 : index
    %c0_4 = arith.constant 0 : index
    %c0_5 = arith.constant 0 : index
    %5 = vector.load %arg2[%c64, %c0_4, %c0_5] : memref<98x1x32xf32, #tpu.memory_space<vmem>>, vector<1x1x32xf32>
    %6 = vector.shape_cast %5 : vector<1x1x32xf32> to vector<1x32xf32>
    %7 = arith.addf %4, %6 : vector<1x32xf32>
    %c96_i32 = arith.constant 96 : i32
    %8 = arith.addi %c96_i32, %1 : i32
    %9 = arith.index_cast %8 : i32 to index
    %c0_6 = arith.constant 0 : index
    %c0_7 = arith.constant 0 : index
    %10 = vector.load %arg2[%9, %c0_6, %c0_7] : memref<98x1x32xf32, #tpu.memory_space<vmem>>, vector<1x1x32xf32>
    %11 = vector.shape_cast %10 : vector<1x1x32xf32> to vector<1x32xf32>
    %12 = arith.addf %7, %11 : vector<1x32xf32>
    %c0_8 = arith.constant 0 : index
    %c0_9 = arith.constant 0 : index
    %13 = vector.load %arg12[%c0_8, %c0_9] : memref<16x32xf32, #tpu.memory_space<vmem>>, vector<1x32xf32>
    tpu.vector_store %arg12[%c0_8, %c0_9], %12 {strides = array<i32>} : memref<16x32xf32, #tpu.memory_space<vmem>>, vector<1x32xf32>,
    %c0_10 = arith.constant 0 : index
    %c1_11 = arith.constant 1 : index
    %14 = memref.load %arg0[%c0_10, %c1_11] : memref<2x16xi32, #tpu.memory_space<smem>>
    %c1_12 = arith.constant 1 : index
    %c1_13 = arith.constant 1 : index
    %15 = memref.load %arg0[%c1_12, %c1_13] : memref<2x16xi32, #tpu.memory_space<smem>>
    %16 = arith.index_cast %14 : i32 to index
    %c0_14 = arith.constant 0 : index
    %c0_15 = arith.constant 0 : index
    %17 = vector.load %arg2[%16, %c0_14, %c0_15] : memref<98x1x32xf32, #tpu.memory_space<vmem>>, vector<1x1x32xf32>
    %18 = vector.shape_cast %17 : vector<1x1x32xf32> to vector<1x32xf32>
    %c65 = arith.constant 65 : index
    %c0_16 = arith.constant 0 : index
    %c0_17 = arith.constant 0 : index
    %19 = vector.load %arg2[%c65, %c0_16, %c0_17] : memref<98x1x32xf32, #tpu.memory_space<vmem>>, vector<1x1x32xf32>
    %20 = vector.shape_cast %19 : vector<1x1x32xf32> to vector<1x32xf32>
    %21 = arith.addf %18, %20 : vector<1x32xf32>
    %c96_i32_18 = arith.constant 96 : i32
    %22 = arith.addi %c96_i32_18, %15 : i32
    %23 = arith.index_cast %22 : i32 to index
    %c0_19 = arith.constant 0 : index
    %c0_20 = arith.constant 0 : index
    %24 = vector.load %arg2[%23, %c0_19, %c0_20] : memref<98x1x32xf32, #tpu.memory_space<vmem>>, vector<1x1x32xf32>
    %25 = vector.shape_cast %24 : vector<1x1x32xf32> to vector<1x32xf32>
    %26 = arith.addf %21, %25 : vector<1x32xf32>
    %c1_21 = arith.constant 1 : index
    %c0_22 = arith.constant 0 : index
    %27 = vector.load %arg12[%c1_21, %c0_22] : memref<16x32xf32, #tpu.memory_space<vmem>>, vector<1x32xf32>
    tpu.vector_store %arg12[%c1_21, %c0_22], %26 {strides = array<i32>} : memref<16x32xf32, #tpu.memory_space<vmem>>, vector<1x32xf32>,
    %c0_23 = arith.constant 0 : index
    %c2 = arith.constant 2 : index
    %28 = memref.load %arg0[%c0_23, %c2] : memref<2x16xi32, #tpu.memory_space<smem>>
    %c1_24 = arith.constant 1 : index
    %c2_25 = arith.constant 2 : index
    %29 = memref.load %arg0[%c1_24, %c2_25] : memref<2x16xi32, #tpu.memory_space<smem>>
    %30 = arith.index_cast %28 : i32 to index
    %c0_26 = arith.constant 0 : index
    %c0_27 = arith.constant 0 : index
    %31 = vector.load %arg2[%30, %c0_26, %c0_27] : memref<98x1x32xf32, #tpu.memory_space<vmem>>, vector<1x1x32xf32>
    %32 = vector.shape_cast %31 : vector<1x1x32xf32> to vector<1x32xf32>
    %c66 = arith.constant 66 : index
    %c0_28 = arith.constant 0 : index
    %c0_29 = arith.constant 0 : index
    %33 = vector.load %arg2[%c66, %c0_28, %c0_29] : memref<98x1x32xf32, #tpu.memory_space<vmem>>, vector<1x1x32xf32>
    %34 = vector.shape_cast %33 : vector<1x1x32xf32> to vector<1x32xf32>
    %35 = arith.addf %32, %34 : vector<1x32xf32>
    %c96_i32_30 = arith.constant 96 : i32
    %36 = arith.addi %c96_i32_30, %29 : i32
    %37 = arith.index_cast %36 : i32 to index
    %c0_31 = arith.constant 0 : index
    %c0_32 = arith.constant 0 : index
    %38 = vector.load %arg2[%37, %c0_31, %c0_32] : memref<98x1x32xf32, #tpu.memory_space<vmem>>, vector<1x1x32xf32>
    %39 = vector.shape_cast %38 : vector<1x1x32xf32> to vector<1x32xf32>
    %40 = arith.addf %35, %39 : vector<1x32xf32>
    %c2_33 = arith.constant 2 : index
    %c0_34 = arith.constant 0 : index
    %41 = vector.load %arg12[%c2_33, %c0_34] : memref<16x32xf32, #tpu.memory_space<vmem>>, vector<1x32xf32>
    tpu.vector_store %arg12[%c2_33, %c0_34], %40 {strides = array<i32>} : memref<16x32xf32, #tpu.memory_space<vmem>>, vector<1x32xf32>,
    %c0_35 = arith.constant 0 : index
    %c3 = arith.constant 3 : index
    %42 = memref.load %arg0[%c0_35, %c3] : memref<2x16xi32, #tpu.memory_space<smem>>
    %c1_36 = arith.constant 1 : index
    %c3_37 = arith.constant 3 : index
    %43 = memref.load %arg0[%c1_36, %c3_37] : memref<2x16xi32, #tpu.memory_space<smem>>
    %44 = arith.index_cast %42 : i32 to index
    %c0_38 = arith.constant 0 : index
    %c0_39 = arith.constant 0 : index
    %45 = vector.load %arg2[%44, %c0_38, %c0_39] : memref<98x1x32xf32, #tpu.memory_space<vmem>>, vector<1x1x32xf32>
    %46 = vector.shape_cast %45 : vector<1x1x32xf32> to vector<1x32xf32>
    %c67 = arith.constant 67 : index
    %c0_40 = arith.constant 0 : index
    %c0_41 = arith.constant 0 : index
    %47 = vector.load %arg2[%c67, %c0_40, %c0_41] : memref<98x1x32xf32, #tpu.memory_space<vmem>>, vector<1x1x32xf32>
    %48 = vector.shape_cast %47 : vector<1x1x32xf32> to vector<1x32xf32>
    %49 = arith.addf %46, %48 : vector<1x32xf32>
    %c96_i32_42 = arith.constant 96 : i32
    %50 = arith.addi %c96_i32_42, %43 : i32
    %51 = arith.index_cast %50 : i32 to index
    %c0_43 = arith.constant 0 : index
    %c0_44 = arith.constant 0 : index
    %52 = vector.load %arg2[%51, %c0_43, %c0_44] : memref<98x1x32xf32, #tpu.memory_space<vmem>>, vector<1x1x32xf32>
    %53 = vector.shape_cast %52 : vector<1x1x32xf32> to vector<1x32xf32>
    %54 = arith.addf %49, %53 : vector<1x32xf32>
    %c3_45 = arith.constant 3 : index
    %c0_46 = arith.constant 0 : index
    %55 = vector.load %arg12[%c3_45, %c0_46] : memref<16x32xf32, #tpu.memory_space<vmem>>, vector<1x32xf32>
    tpu.vector_store %arg12[%c3_45, %c0_46], %54 {strides = array<i32>} : memref<16x32xf32, #tpu.memory_space<vmem>>, vector<1x32xf32>,
    %c0_47 = arith.constant 0 : index
    %c4 = arith.constant 4 : index
    %56 = memref.load %arg0[%c0_47, %c4] : memref<2x16xi32, #tpu.memory_space<smem>>
    %c1_48 = arith.constant 1 : index
    %c4_49 = arith.constant 4 : index
    %57 = memref.load %arg0[%c1_48, %c4_49] : memref<2x16xi32, #tpu.memory_space<smem>>
    %58 = arith.index_cast %56 : i32 to index
    %c0_50 = arith.constant 0 : index
    %c0_51 = arith.constant 0 : index
    %59 = vector.load %arg2[%58, %c0_50, %c0_51] : memref<98x1x32xf32, #tpu.memory_space<vmem>>, vector<1x1x32xf32>
    %60 = vector.shape_cast %59 : vector<1x1x32xf32> to vector<1x32xf32>
    %c68 = arith.constant 68 : index
    %c0_52 = arith.constant 0 : index
    %c0_53 = arith.constant 0 : index
    %61 = vector.load %arg2[%c68, %c0_52, %c0_53] : memref<98x1x32xf32, #tpu.memory_space<vmem>>, vector<1x1x32xf32>
    %62 = vector.shape_cast %61 : vector<1x1x32xf32> to vector<1x32xf32>
    %63 = arith.addf %60, %62 : vector<1x32xf32>
    %c96_i32_54 = arith.constant 96 : i32
    %64 = arith.addi %c96_i32_54, %57 : i32
    %65 = arith.index_cast %64 : i32 to index
    %c0_55 = arith.constant 0 : index
    %c0_56 = arith.constant 0 : index
    %66 = vector.load %arg2[%65, %c0_55, %c0_56] : memref<98x1x32xf32, #tpu.memory_space<vmem>>, vector<1x1x32xf32>
    %67 = vector.shape_cast %66 : vector<1x1x32xf32> to vector<1x32xf32>
    %68 = arith.addf %63, %67 : vector<1x32xf32>
    %c4_57 = arith.constant 4 : index
    %c0_58 = arith.constant 0 : index
    %69 = vector.load %arg12[%c4_57, %c0_58] : memref<16x32xf32, #tpu.memory_space<vmem>>, vector<1x32xf32>
    tpu.vector_store %arg12[%c4_57, %c0_58], %68 {strides = array<i32>} : memref<16x32xf32, #tpu.memory_space<vmem>>, vector<1x32xf32>,
    %c0_59 = arith.constant 0 : index
    %c5 = arith.constant 5 : index
    %70 = memref.load %arg0[%c0_59, %c5] : memref<2x16xi32, #tpu.memory_space<smem>>
    %c1_60 = arith.constant 1 : index
    %c5_61 = arith.constant 5 : index
    %71 = memref.load %arg0[%c1_60, %c5_61] : memref<2x16xi32, #tpu.memory_space<smem>>
    %72 = arith.index_cast %70 : i32 to index
    %c0_62 = arith.constant 0 : index
    %c0_63 = arith.constant 0 : index
    %73 = vector.load %arg2[%72, %c0_62, %c0_63] : memref<98x1x32xf32, #tpu.memory_space<vmem>>, vector<1x1x32xf32>
    %74 = vector.shape_cast %73 : vector<1x1x32xf32> to vector<1x32xf32>
    %c69 = arith.constant 69 : index
    %c0_64 = arith.constant 0 : index
    %c0_65 = arith.constant 0 : index
    %75 = vector.load %arg2[%c69, %c0_64, %c0_65] : memref<98x1x32xf32, #tpu.memory_space<vmem>>, vector<1x1x32xf32>
    %76 = vector.shape_cast %75 : vector<1x1x32xf32> to vector<1x32xf32>
    %77 = arith.addf %74, %76 : vector<1x32xf32>
    %c96_i32_66 = arith.constant 96 : i32
    %78 = arith.addi %c96_i32_66, %71 : i32
    %79 = arith.index_cast %78 : i32 to index
    %c0_67 = arith.constant 0 : index
    %c0_68 = arith.constant 0 : index
    %80 = vector.load %arg2[%79, %c0_67, %c0_68] : memref<98x1x32xf32, #tpu.memory_space<vmem>>, vector<1x1x32xf32>
    %81 = vector.shape_cast %80 : vector<1x1x32xf32> to vector<1x32xf32>
    %82 = arith.addf %77, %81 : vector<1x32xf32>
    %c5_69 = arith.constant 5 : index
    %c0_70 = arith.constant 0 : index
    %83 = vector.load %arg12[%c5_69, %c0_70] : memref<16x32xf32, #tpu.memory_space<vmem>>, vector<1x32xf32>
    tpu.vector_store %arg12[%c5_69, %c0_70], %82 {strides = array<i32>} : memref<16x32xf32, #tpu.memory_space<vmem>>, vector<1x32xf32>,
    %c0_71 = arith.constant 0 : index
    %c6 = arith.constant 6 : index
    %84 = memref.load %arg0[%c0_71, %c6] : memref<2x16xi32, #tpu.memory_space<smem>>
    %c1_72 = arith.constant 1 : index
    %c6_73 = arith.constant 6 : index
    %85 = memref.load %arg0[%c1_72, %c6_73] : memref<2x16xi32, #tpu.memory_space<smem>>
    %86 = arith.index_cast %84 : i32 to index
    %c0_74 = arith.constant 0 : index
    %c0_75 = arith.constant 0 : index
    %87 = vector.load %arg2[%86, %c0_74, %c0_75] : memref<98x1x32xf32, #tpu.memory_space<vmem>>, vector<1x1x32xf32>
    %88 = vector.shape_cast %87 : vector<1x1x32xf32> to vector<1x32xf32>
    %c70 = arith.constant 70 : index
    %c0_76 = arith.constant 0 : index
    %c0_77 = arith.constant 0 : index
    %89 = vector.load %arg2[%c70, %c0_76, %c0_77] : memref<98x1x32xf32, #tpu.memory_space<vmem>>, vector<1x1x32xf32>
    %90 = vector.shape_cast %89 : vector<1x1x32xf32> to vector<1x32xf32>
    %91 = arith.addf %88, %90 : vector<1x32xf32>
    %c96_i32_78 = arith.constant 96 : i32
    %92 = arith.addi %c96_i32_78, %85 : i32
    %93 = arith.index_cast %92 : i32 to index
    %c0_79 = arith.constant 0 : index
    %c0_80 = arith.constant 0 : index
    %94 = vector.load %arg2[%93, %c0_79, %c0_80] : memref<98x1x32xf32, #tpu.memory_space<vmem>>, vector<1x1x32xf32>
    %95 = vector.shape_cast %94 : vector<1x1x32xf32> to vector<1x32xf32>
    %96 = arith.addf %91, %95 : vector<1x32xf32>
    %c6_81 = arith.constant 6 : index
    %c0_82 = arith.constant 0 : index
    %97 = vector.load %arg12[%c6_81, %c0_82] : memref<16x32xf32, #tpu.memory_space<vmem>>, vector<1x32xf32>
    tpu.vector_store %arg12[%c6_81, %c0_82], %96 {strides = array<i32>} : memref<16x32xf32, #tpu.memory_space<vmem>>, vector<1x32xf32>,
    %c0_83 = arith.constant 0 : index
    %c7 = arith.constant 7 : index
    %98 = memref.load %arg0[%c0_83, %c7] : memref<2x16xi32, #tpu.memory_space<smem>>
    %c1_84 = arith.constant 1 : index
    %c7_85 = arith.constant 7 : index
    %99 = memref.load %arg0[%c1_84, %c7_85] : memref<2x16xi32, #tpu.memory_space<smem>>
    %100 = arith.index_cast %98 : i32 to index
    %c0_86 = arith.constant 0 : index
    %c0_87 = arith.constant 0 : index
    %101 = vector.load %arg2[%100, %c0_86, %c0_87] : memref<98x1x32xf32, #tpu.memory_space<vmem>>, vector<1x1x32xf32>
    %102 = vector.shape_cast %101 : vector<1x1x32xf32> to vector<1x32xf32>
    %c71 = arith.constant 71 : index
    %c0_88 = arith.constant 0 : index
    %c0_89 = arith.constant 0 : index
    %103 = vector.load %arg2[%c71, %c0_88, %c0_89] : memref<98x1x32xf32, #tpu.memory_space<vmem>>, vector<1x1x32xf32>
    %104 = vector.shape_cast %103 : vector<1x1x32xf32> to vector<1x32xf32>
    %105 = arith.addf %102, %104 : vector<1x32xf32>
    %c96_i32_90 = arith.constant 96 : i32
    %106 = arith.addi %c96_i32_90, %99 : i32
    %107 = arith.index_cast %106 : i32 to index
    %c0_91 = arith.constant 0 : index
    %c0_92 = arith.constant 0 : index
    %108 = vector.load %arg2[%107, %c0_91, %c0_92] : memref<98x1x32xf32, #tpu.memory_space<vmem>>, vector<1x1x32xf32>
    %109 = vector.shape_cast %108 : vector<1x1x32xf32> to vector<1x32xf32>
    %110 = arith.addf %105, %109 : vector<1x32xf32>
    %c7_93 = arith.constant 7 : index
    %c0_94 = arith.constant 0 : index
    %111 = vector.load %arg12[%c7_93, %c0_94] : memref<16x32xf32, #tpu.memory_space<vmem>>, vector<1x32xf32>
    tpu.vector_store %arg12[%c7_93, %c0_94], %110 {strides = array<i32>} : memref<16x32xf32, #tpu.memory_space<vmem>>, vector<1x32xf32>,
    %c0_95 = arith.constant 0 : index
    %c8 = arith.constant 8 : index
    %112 = memref.load %arg0[%c0_95, %c8] : memref<2x16xi32, #tpu.memory_space<smem>>
    %c1_96 = arith.constant 1 : index
    %c8_97 = arith.constant 8 : index
    %113 = memref.load %arg0[%c1_96, %c8_97] : memref<2x16xi32, #tpu.memory_space<smem>>
    %114 = arith.index_cast %112 : i32 to index
    %c0_98 = arith.constant 0 : index
    %c0_99 = arith.constant 0 : index
    %115 = vector.load %arg2[%114, %c0_98, %c0_99] : memref<98x1x32xf32, #tpu.memory_space<vmem>>, vector<1x1x32xf32>
    %116 = vector.shape_cast %115 : vector<1x1x32xf32> to vector<1x32xf32>
    %c64_100 = arith.constant 64 : index
    %c0_101 = arith.constant 0 : index
    %c0_102 = arith.constant 0 : index
    %117 = vector.load %arg2[%c64_100, %c0_101, %c0_102] : memref<98x1x32xf32, #tpu.memory_space<vmem>>, vector<1x1x32xf32>
    %118 = vector.shape_cast %117 : vector<1x1x32xf32> to vector<1x32xf32>
    %119 = arith.addf %116, %118 : vector<1x32xf32>
    %c96_i32_103 = arith.constant 96 : i32
    %120 = arith.addi %c96_i32_103, %113 : i32
    %121 = arith.index_cast %120 : i32 to index
    %c0_104 = arith.constant 0 : index
    %c0_105 = arith.constant 0 : index
    %122 = vector.load %arg2[%121, %c0_104, %c0_105] : memref<98x1x32xf32, #tpu.memory_space<vmem>>, vector<1x1x32xf32>
    %123 = vector.shape_cast %122 : vector<1x1x32xf32> to vector<1x32xf32>
    %124 = arith.addf %119, %123 : vector<1x32xf32>
    %c8_106 = arith.constant 8 : index
    %c0_107 = arith.constant 0 : index
    %125 = vector.load %arg12[%c8_106, %c0_107] : memref<16x32xf32, #tpu.memory_space<vmem>>, vector<1x32xf32>
    tpu.vector_store %arg12[%c8_106, %c0_107], %124 {strides = array<i32>} : memref<16x32xf32, #tpu.memory_space<vmem>>, vector<1x32xf32>,
    %c0_108 = arith.constant 0 : index
    %c9 = arith.constant 9 : index
    %126 = memref.load %arg0[%c0_108, %c9] : memref<2x16xi32, #tpu.memory_space<smem>>
    %c1_109 = arith.constant 1 : index
    %c9_110 = arith.constant 9 : index
    %127 = memref.load %arg0[%c1_109, %c9_110] : memref<2x16xi32, #tpu.memory_space<smem>>
    %128 = arith.index_cast %126 : i32 to index
    %c0_111 = arith.constant 0 : index
    %c0_112 = arith.constant 0 : index
    %129 = vector.load %arg2[%128, %c0_111, %c0_112] : memref<98x1x32xf32, #tpu.memory_space<vmem>>, vector<1x1x32xf32>
    %130 = vector.shape_cast %129 : vector<1x1x32xf32> to vector<1x32xf32>
    %c65_113 = arith.constant 65 : index
    %c0_114 = arith.constant 0 : index
    %c0_115 = arith.constant 0 : index
    %131 = vector.load %arg2[%c65_113, %c0_114, %c0_115] : memref<98x1x32xf32, #tpu.memory_space<vmem>>, vector<1x1x32xf32>
    %132 = vector.shape_cast %131 : vector<1x1x32xf32> to vector<1x32xf32>
    %133 = arith.addf %130, %132 : vector<1x32xf32>
    %c96_i32_116 = arith.constant 96 : i32
    %134 = arith.addi %c96_i32_116, %127 : i32
    %135 = arith.index_cast %134 : i32 to index
    %c0_117 = arith.constant 0 : index
    %c0_118 = arith.constant 0 : index
    %136 = vector.load %arg2[%135, %c0_117, %c0_118] : memref<98x1x32xf32, #tpu.memory_space<vmem>>, vector<1x1x32xf32>
    %137 = vector.shape_cast %136 : vector<1x1x32xf32> to vector<1x32xf32>
    %138 = arith.addf %133, %137 : vector<1x32xf32>
    %c9_119 = arith.constant 9 : index
    %c0_120 = arith.constant 0 : index
    %139 = vector.load %arg12[%c9_119, %c0_120] : memref<16x32xf32, #tpu.memory_space<vmem>>, vector<1x32xf32>
    tpu.vector_store %arg12[%c9_119, %c0_120], %138 {strides = array<i32>} : memref<16x32xf32, #tpu.memory_space<vmem>>, vector<1x32xf32>,
    %c0_121 = arith.constant 0 : index
    %c10 = arith.constant 10 : index
    %140 = memref.load %arg0[%c0_121, %c10] : memref<2x16xi32, #tpu.memory_space<smem>>
    %c1_122 = arith.constant 1 : index
    %c10_123 = arith.constant 10 : index
    %141 = memref.load %arg0[%c1_122, %c10_123] : memref<2x16xi32, #tpu.memory_space<smem>>
    %142 = arith.index_cast %140 : i32 to index
    %c0_124 = arith.constant 0 : index
    %c0_125 = arith.constant 0 : index
    %143 = vector.load %arg2[%142, %c0_124, %c0_125] : memref<98x1x32xf32, #tpu.memory_space<vmem>>, vector<1x1x32xf32>
    %144 = vector.shape_cast %143 : vector<1x1x32xf32> to vector<1x32xf32>
    %c66_126 = arith.constant 66 : index
    %c0_127 = arith.constant 0 : index
    %c0_128 = arith.constant 0 : index
    %145 = vector.load %arg2[%c66_126, %c0_127, %c0_128] : memref<98x1x32xf32, #tpu.memory_space<vmem>>, vector<1x1x32xf32>
    %146 = vector.shape_cast %145 : vector<1x1x32xf32> to vector<1x32xf32>
    %147 = arith.addf %144, %146 : vector<1x32xf32>
    %c96_i32_129 = arith.constant 96 : i32
    %148 = arith.addi %c96_i32_129, %141 : i32
    %149 = arith.index_cast %148 : i32 to index
    %c0_130 = arith.constant 0 : index
    %c0_131 = arith.constant 0 : index
    %150 = vector.load %arg2[%149, %c0_130, %c0_131] : memref<98x1x32xf32, #tpu.memory_space<vmem>>, vector<1x1x32xf32>
    %151 = vector.shape_cast %150 : vector<1x1x32xf32> to vector<1x32xf32>
    %152 = arith.addf %147, %151 : vector<1x32xf32>
    %c10_132 = arith.constant 10 : index
    %c0_133 = arith.constant 0 : index
    %153 = vector.load %arg12[%c10_132, %c0_133] : memref<16x32xf32, #tpu.memory_space<vmem>>, vector<1x32xf32>
    tpu.vector_store %arg12[%c10_132, %c0_133], %152 {strides = array<i32>} : memref<16x32xf32, #tpu.memory_space<vmem>>, vector<1x32xf32>,
    %c0_134 = arith.constant 0 : index
    %c11 = arith.constant 11 : index
    %154 = memref.load %arg0[%c0_134, %c11] : memref<2x16xi32, #tpu.memory_space<smem>>
    %c1_135 = arith.constant 1 : index
    %c11_136 = arith.constant 11 : index
    %155 = memref.load %arg0[%c1_135, %c11_136] : memref<2x16xi32, #tpu.memory_space<smem>>
    %156 = arith.index_cast %154 : i32 to index
    %c0_137 = arith.constant 0 : index
    %c0_138 = arith.constant 0 : index
    %157 = vector.load %arg2[%156, %c0_137, %c0_138] : memref<98x1x32xf32, #tpu.memory_space<vmem>>, vector<1x1x32xf32>
    %158 = vector.shape_cast %157 : vector<1x1x32xf32> to vector<1x32xf32>
    %c67_139 = arith.constant 67 : index
    %c0_140 = arith.constant 0 : index
    %c0_141 = arith.constant 0 : index
    %159 = vector.load %arg2[%c67_139, %c0_140, %c0_141] : memref<98x1x32xf32, #tpu.memory_space<vmem>>, vector<1x1x32xf32>
    %160 = vector.shape_cast %159 : vector<1x1x32xf32> to vector<1x32xf32>
    %161 = arith.addf %158, %160 : vector<1x32xf32>
    %c96_i32_142 = arith.constant 96 : i32
    %162 = arith.addi %c96_i32_142, %155 : i32
    %163 = arith.index_cast %162 : i32 to index
    %c0_143 = arith.constant 0 : index
    %c0_144 = arith.constant 0 : index
    %164 = vector.load %arg2[%163, %c0_143, %c0_144] : memref<98x1x32xf32, #tpu.memory_space<vmem>>, vector<1x1x32xf32>
    %165 = vector.shape_cast %164 : vector<1x1x32xf32> to vector<1x32xf32>
    %166 = arith.addf %161, %165 : vector<1x32xf32>
    %c11_145 = arith.constant 11 : index
    %c0_146 = arith.constant 0 : index
    %167 = vector.load %arg12[%c11_145, %c0_146] : memref<16x32xf32, #tpu.memory_space<vmem>>, vector<1x32xf32>
    tpu.vector_store %arg12[%c11_145, %c0_146], %166 {strides = array<i32>} : memref<16x32xf32, #tpu.memory_space<vmem>>, vector<1x32xf32>,
    %c0_147 = arith.constant 0 : index
    %c12 = arith.constant 12 : index
    %168 = memref.load %arg0[%c0_147, %c12] : memref<2x16xi32, #tpu.memory_space<smem>>
    %c1_148 = arith.constant 1 : index
    %c12_149 = arith.constant 12 : index
    %169 = memref.load %arg0[%c1_148, %c12_149] : memref<2x16xi32, #tpu.memory_space<smem>>
    %170 = arith.index_cast %168 : i32 to index
    %c0_150 = arith.constant 0 : index
    %c0_151 = arith.constant 0 : index
    %171 = vector.load %arg2[%170, %c0_150, %c0_151] : memref<98x1x32xf32, #tpu.memory_space<vmem>>, vector<1x1x32xf32>
    %172 = vector.shape_cast %171 : vector<1x1x32xf32> to vector<1x32xf32>
    %c68_152 = arith.constant 68 : index
    %c0_153 = arith.constant 0 : index
    %c0_154 = arith.constant 0 : index
    %173 = vector.load %arg2[%c68_152, %c0_153, %c0_154] : memref<98x1x32xf32, #tpu.memory_space<vmem>>, vector<1x1x32xf32>
    %174 = vector.shape_cast %173 : vector<1x1x32xf32> to vector<1x32xf32>
    %175 = arith.addf %172, %174 : vector<1x32xf32>
    %c96_i32_155 = arith.constant 96 : i32
    %176 = arith.addi %c96_i32_155, %169 : i32
    %177 = arith.index_cast %176 : i32 to index
    %c0_156 = arith.constant 0 : index
    %c0_157 = arith.constant 0 : index
    %178 = vector.load %arg2[%177, %c0_156, %c0_157] : memref<98x1x32xf32, #tpu.memory_space<vmem>>, vector<1x1x32xf32>
    %179 = vector.shape_cast %178 : vector<1x1x32xf32> to vector<1x32xf32>
    %180 = arith.addf %175, %179 : vector<1x32xf32>
    %c12_158 = arith.constant 12 : index
    %c0_159 = arith.constant 0 : index
    %181 = vector.load %arg12[%c12_158, %c0_159] : memref<16x32xf32, #tpu.memory_space<vmem>>, vector<1x32xf32>
    tpu.vector_store %arg12[%c12_158, %c0_159], %180 {strides = array<i32>} : memref<16x32xf32, #tpu.memory_space<vmem>>, vector<1x32xf32>,
    %c0_160 = arith.constant 0 : index
    %c13 = arith.constant 13 : index
    %182 = memref.load %arg0[%c0_160, %c13] : memref<2x16xi32, #tpu.memory_space<smem>>
    %c1_161 = arith.constant 1 : index
    %c13_162 = arith.constant 13 : index
    %183 = memref.load %arg0[%c1_161, %c13_162] : memref<2x16xi32, #tpu.memory_space<smem>>
    %184 = arith.index_cast %182 : i32 to index
    %c0_163 = arith.constant 0 : index
    %c0_164 = arith.constant 0 : index
    %185 = vector.load %arg2[%184, %c0_163, %c0_164] : memref<98x1x32xf32, #tpu.memory_space<vmem>>, vector<1x1x32xf32>
    %186 = vector.shape_cast %185 : vector<1x1x32xf32> to vector<1x32xf32>
    %c69_165 = arith.constant 69 : index
    %c0_166 = arith.constant 0 : index
    %c0_167 = arith.constant 0 : index
    %187 = vector.load %arg2[%c69_165, %c0_166, %c0_167] : memref<98x1x32xf32, #tpu.memory_space<vmem>>, vector<1x1x32xf32>
    %188 = vector.shape_cast %187 : vector<1x1x32xf32> to vector<1x32xf32>
    %189 = arith.addf %186, %188 : vector<1x32xf32>
    %c96_i32_168 = arith.constant 96 : i32
    %190 = arith.addi %c96_i32_168, %183 : i32
    %191 = arith.index_cast %190 : i32 to index
    %c0_169 = arith.constant 0 : index
    %c0_170 = arith.constant 0 : index
    %192 = vector.load %arg2[%191, %c0_169, %c0_170] : memref<98x1x32xf32, #tpu.memory_space<vmem>>, vector<1x1x32xf32>
    %193 = vector.shape_cast %192 : vector<1x1x32xf32> to vector<1x32xf32>
    %194 = arith.addf %189, %193 : vector<1x32xf32>
    %c13_171 = arith.constant 13 : index
    %c0_172 = arith.constant 0 : index
    %195 = vector.load %arg12[%c13_171, %c0_172] : memref<16x32xf32, #tpu.memory_space<vmem>>, vector<1x32xf32>
    tpu.vector_store %arg12[%c13_171, %c0_172], %194 {strides = array<i32>} : memref<16x32xf32, #tpu.memory_space<vmem>>, vector<1x32xf32>,
    %c0_173 = arith.constant 0 : index
    %c14 = arith.constant 14 : index
    %196 = memref.load %arg0[%c0_173, %c14] : memref<2x16xi32, #tpu.memory_space<smem>>
    %c1_174 = arith.constant 1 : index
    %c14_175 = arith.constant 14 : index
    %197 = memref.load %arg0[%c1_174, %c14_175] : memref<2x16xi32, #tpu.memory_space<smem>>
    %198 = arith.index_cast %196 : i32 to index
    %c0_176 = arith.constant 0 : index
    %c0_177 = arith.constant 0 : index
    %199 = vector.load %arg2[%198, %c0_176, %c0_177] : memref<98x1x32xf32, #tpu.memory_space<vmem>>, vector<1x1x32xf32>
    %200 = vector.shape_cast %199 : vector<1x1x32xf32> to vector<1x32xf32>
    %c70_178 = arith.constant 70 : index
    %c0_179 = arith.constant 0 : index
    %c0_180 = arith.constant 0 : index
    %201 = vector.load %arg2[%c70_178, %c0_179, %c0_180] : memref<98x1x32xf32, #tpu.memory_space<vmem>>, vector<1x1x32xf32>
    %202 = vector.shape_cast %201 : vector<1x1x32xf32> to vector<1x32xf32>
    %203 = arith.addf %200, %202 : vector<1x32xf32>
    %c96_i32_181 = arith.constant 96 : i32
    %204 = arith.addi %c96_i32_181, %197 : i32
    %205 = arith.index_cast %204 : i32 to index
    %c0_182 = arith.constant 0 : index
    %c0_183 = arith.constant 0 : index
    %206 = vector.load %arg2[%205, %c0_182, %c0_183] : memref<98x1x32xf32, #tpu.memory_space<vmem>>, vector<1x1x32xf32>
    %207 = vector.shape_cast %206 : vector<1x1x32xf32> to vector<1x32xf32>
    %208 = arith.addf %203, %207 : vector<1x32xf32>
    %c14_184 = arith.constant 14 : index
    %c0_185 = arith.constant 0 : index
    %209 = vector.load %arg12[%c14_184, %c0_185] : memref<16x32xf32, #tpu.memory_space<vmem>>, vector<1x32xf32>
    tpu.vector_store %arg12[%c14_184, %c0_185], %208 {strides = array<i32>} : memref<16x32xf32, #tpu.memory_space<vmem>>, vector<1x32xf32>,
    %c0_186 = arith.constant 0 : index
    %c15 = arith.constant 15 : index
    %210 = memref.load %arg0[%c0_186, %c15] : memref<2x16xi32, #tpu.memory_space<smem>>
    %c1_187 = arith.constant 1 : index
    %c15_188 = arith.constant 15 : index
    %211 = memref.load %arg0[%c1_187, %c15_188] : memref<2x16xi32, #tpu.memory_space<smem>>
    %212 = arith.index_cast %210 : i32 to index
    %c0_189 = arith.constant 0 : index
    %c0_190 = arith.constant 0 : index
    %213 = vector.load %arg2[%212, %c0_189, %c0_190] : memref<98x1x32xf32, #tpu.memory_space<vmem>>, vector<1x1x32xf32>
    %214 = vector.shape_cast %213 : vector<1x1x32xf32> to vector<1x32xf32>
    %c71_191 = arith.constant 71 : index
    %c0_192 = arith.constant 0 : index
    %c0_193 = arith.constant 0 : index
    %215 = vector.load %arg2[%c71_191, %c0_192, %c0_193] : memref<98x1x32xf32, #tpu.memory_space<vmem>>, vector<1x1x32xf32>
    %216 = vector.shape_cast %215 : vector<1x1x32xf32> to vector<1x32xf32>
    %217 = arith.addf %214, %216 : vector<1x32xf32>
    %c96_i32_194 = arith.constant 96 : i32
    %218 = arith.addi %c96_i32_194, %211 : i32
    %219 = arith.index_cast %218 : i32 to index
    %c0_195 = arith.constant 0 : index
    %c0_196 = arith.constant 0 : index
    %220 = vector.load %arg2[%219, %c0_195, %c0_196] : memref<98x1x32xf32, #tpu.memory_space<vmem>>, vector<1x1x32xf32>
    %221 = vector.shape_cast %220 : vector<1x1x32xf32> to vector<1x32xf32>
    %222 = arith.addf %217, %221 : vector<1x32xf32>
    %c15_197 = arith.constant 15 : index
    %c0_198 = arith.constant 0 : index
    %223 = vector.load %arg12[%c15_197, %c0_198] : memref<16x32xf32, #tpu.memory_space<vmem>>, vector<1x32xf32>
    tpu.vector_store %arg12[%c15_197, %c0_198], %222 {strides = array<i32>} : memref<16x32xf32, #tpu.memory_space<vmem>>, vector<1x32xf32>,
    %c0_199 = arith.constant 0 : index
    %c0_200 = arith.constant 0 : index
    %224 = vector.load %arg8[%c0_199, %c0_200] : memref<8x128xf32, #tpu.memory_space<vmem>>, vector<8x128xf32>
    %c0_201 = arith.constant 0 : index
    %c0_202 = arith.constant 0 : index
    %225 = vector.load %arg12[%c0_201, %c0_202] : memref<16x32xf32, #tpu.memory_space<vmem>>, vector<16x32xf32>
    %226 = vector.shape_cast %225 : vector<16x32xf32> to vector<2x8x32xf32>
    %227 = vector.extract_strided_slice %224 {offsets = [0, 0], sizes = [1, 32], strides = [1, 1]} : vector<8x128xf32> to vector<1x32xf32>
    %228 = vector.extract_strided_slice %224 {offsets = [1, 0], sizes = [1, 32], strides = [1, 1]} : vector<8x128xf32> to vector<1x32xf32>
    %cst = arith.constant dense<0.000000e+00> : vector<2x8xf32>
    %229 = vector.multi_reduction <add>, %226, %cst [2] : vector<2x8x32xf32> to vector<2x8xf32>
    %230 = vector.shape_cast %229 : vector<2x8xf32> to vector<2x8x1xf32>
    %cst_203 = arith.constant 3.200000e+01 : f32
    %231 = vector.broadcast %cst_203 : f32 to vector<2x8x1xf32>
    %232 = arith.divf %230, %231 : vector<2x8x1xf32>
    %233 = vector.broadcast %232 : vector<2x8x1xf32> to vector<2x8x32xf32>
    %234 = arith.subf %226, %233 : vector<2x8x32xf32>
    %235 = arith.mulf %234, %234 : vector<2x8x32xf32>
    %cst_204 = arith.constant dense<0.000000e+00> : vector<2x8xf32>
    %236 = vector.multi_reduction <add>, %235, %cst_204 [2] : vector<2x8x32xf32> to vector<2x8xf32>
    %237 = vector.shape_cast %236 : vector<2x8xf32> to vector<2x8x1xf32>
    %cst_205 = arith.constant 3.200000e+01 : f32
    %238 = vector.broadcast %cst_205 : f32 to vector<2x8x1xf32>
    %239 = arith.divf %237, %238 : vector<2x8x1xf32>
    %240 = vector.broadcast %232 : vector<2x8x1xf32> to vector<2x8x32xf32>
    %241 = arith.subf %226, %240 : vector<2x8x32xf32>
    %cst_206 = arith.constant 9.99999996E-13 : f32
    %242 = vector.broadcast %cst_206 : f32 to vector<2x8x1xf32>
    %243 = arith.addf %239, %242 : vector<2x8x1xf32>
    %244 = math.rsqrt %243 : vector<2x8x1xf32>
    %245 = vector.broadcast %244 : vector<2x8x1xf32> to vector<2x8x32xf32>
    %246 = arith.mulf %241, %245 : vector<2x8x32xf32>
    %247 = vector.shape_cast %227 : vector<1x32xf32> to vector<1x1x32xf32>
    %248 = vector.broadcast %247 : vector<1x1x32xf32> to vector<2x8x32xf32>
    %249 = arith.mulf %246, %248 : vector<2x8x32xf32>
    %250 = vector.shape_cast %228 : vector<1x32xf32> to vector<1x1x32xf32>
    %251 = vector.broadcast %250 : vector<1x1x32xf32> to vector<2x8x32xf32>
    %252 = arith.addf %249, %251 : vector<2x8x32xf32>
    %c0_207 = arith.constant 0 : index
    %c0_208 = arith.constant 0 : index
    %253 = vector.load %arg1[%c0_207, %c0_208] : memref<2x8xf32, #tpu.memory_space<vmem>>, vector<2x8xf32>
    %cst_209 = arith.constant 1.000000e+00 : f32
    %254 = vector.broadcast %cst_209 : f32 to vector<2x8xf32>
    %255 = arith.subf %254, %253 : vector<2x8xf32>
    %cst_210 = arith.constant -1.000000e+09 : f32
    %256 = vector.broadcast %cst_210 : f32 to vector<2x8xf32>
    %257 = arith.mulf %255, %256 : vector<2x8xf32>
    %258 = vector.shape_cast %257 : vector<2x8xf32> to vector<2x1x8xf32>
    %259 = vector.shape_cast %258 : vector<2x1x8xf32> to vector<2x1x8xf32>
    %260 = vector.broadcast %259 : vector<2x1x8xf32> to vector<2x8x8xf32>
    %261 = tpu.concatenate %260, %260 in 0 : vector<2x8x8xf32>, vector<2x8x8xf32> -> vector<4x8x8xf32>
    %c0_211 = arith.constant 0 : index
    %c0_212 = arith.constant 0 : index
    %c0_213 = arith.constant 0 : index
    %262 = vector.load %arg7[%c0_211, %c0_212, %c0_213] : memref<2x8x128xf32, #tpu.memory_space<vmem>>, vector<1x8x128xf32>
    %263 = vector.shape_cast %262 : vector<1x8x128xf32> to vector<8x128xf32>
    %264 = vector.shape_cast %252 : vector<2x8x32xf32> to vector<16x32xf32>
    %c0_214 = arith.constant 0 : index
    %c0_215 = arith.constant 0 : index
    %c0_216 = arith.constant 0 : index
    %265 = vector.load %arg3[%c0_214, %c0_215, %c0_216] : memref<2x32x96xf32, #tpu.memory_space<vmem>>, vector<1x32x96xf32>
    %266 = vector.shape_cast %265 : vector<1x32x96xf32> to vector<32x96xf32>
    %cst_217 = arith.constant dense<0.000000e+00> : vector<16x96xf32>
    %267 = tpu.matmul %264, %266, %cst_217 {dimension_numbers = #tpu.dot_dimension_numbers<[1], [0], [0], [1], [0, 0, 1, 1], [], []>} : vector<16x32xf32>, vector<32x96xf32>, vector<16x96xf32> -> vector<16x96xf32>
    %268 = vector.extract_strided_slice %263 {offsets = [0, 0], sizes = [1, 96], strides = [1, 1]} : vector<8x128xf32> to vector<1x96xf32>
    %269 = vector.broadcast %268 : vector<1x96xf32> to vector<16x96xf32>
    %270 = arith.addf %267, %269 : vector<16x96xf32>
    %271 = vector.extract_strided_slice %270 {offsets = [0, 0], sizes = [16, 32], strides = [1, 1]} : vector<16x96xf32> to vector<16x32xf32>
    %272 = vector.shape_cast %271 : vector<16x32xf32> to vector<2x8x32xf32>
    %273 = vector.extract_strided_slice %270 {offsets = [0, 32], sizes = [16, 32], strides = [1, 1]} : vector<16x96xf32> to vector<16x32xf32>
    %274 = vector.shape_cast %273 : vector<16x32xf32> to vector<2x8x32xf32>
    %275 = vector.extract_strided_slice %270 {offsets = [0, 64], sizes = [16, 32], strides = [1, 1]} : vector<16x96xf32> to vector<16x32xf32>
    %276 = vector.shape_cast %275 : vector<16x32xf32> to vector<2x8x32xf32>
    %277 = vector.extract_strided_slice %272 {offsets = [0, 0, 0], sizes = [2, 8, 16], strides = [1, 1, 1]} : vector<2x8x32xf32> to vector<2x8x16xf32>
    %278 = vector.extract_strided_slice %272 {offsets = [0, 0, 16], sizes = [2, 8, 16], strides = [1, 1, 1]} : vector<2x8x32xf32> to vector<2x8x16xf32>
    %279 = tpu.concatenate %277, %278 in 0 : vector<2x8x16xf32>, vector<2x8x16xf32> -> vector<4x8x16xf32>
    %280 = vector.extract_strided_slice %274 {offsets = [0, 0, 0], sizes = [2, 8, 16], strides = [1, 1, 1]} : vector<2x8x32xf32> to vector<2x8x16xf32>
    %281 = vector.extract_strided_slice %274 {offsets = [0, 0, 16], sizes = [2, 8, 16], strides = [1, 1, 1]} : vector<2x8x32xf32> to vector<2x8x16xf32>
    %282 = tpu.concatenate %280, %281 in 0 : vector<2x8x16xf32>, vector<2x8x16xf32> -> vector<4x8x16xf32>
    %283 = vector.extract_strided_slice %276 {offsets = [0, 0, 0], sizes = [2, 8, 16], strides = [1, 1, 1]} : vector<2x8x32xf32> to vector<2x8x16xf32>
    %284 = vector.extract_strided_slice %276 {offsets = [0, 0, 16], sizes = [2, 8, 16], strides = [1, 1, 1]} : vector<2x8x32xf32> to vector<2x8x16xf32>
    %285 = tpu.concatenate %283, %284 in 0 : vector<2x8x16xf32>, vector<2x8x16xf32> -> vector<4x8x16xf32>
    "tpu.trace_start"() <{level = 10 : i32, message = "nqd,nkd->nqk"}> : () -> ()
    %cst_218 = arith.constant dense<0.000000e+00> : vector<4x8x8xf32>
    %286 = tpu.matmul %279, %282, %cst_218 {dimension_numbers = #tpu.dot_dimension_numbers<[2], [2], [1], [1], [0, 0, 0, 1, 1, 1], [0], [0]>} : vector<4x8x16xf32>, vector<4x8x16xf32>, vector<4x8x8xf32> -> vector<4x8x8xf32>
    "tpu.trace_stop"() : () -> ()
    %287 = arith.addf %286, %261 : vector<4x8x8xf32>
    %cst_219 = arith.constant dense<0xFF800000> : vector<4x8xf32>
    %288 = vector.multi_reduction <maximumf>, %287, %cst_219 [2] : vector<4x8x8xf32> to vector<4x8xf32>
    %289 = vector.shape_cast %288 : vector<4x8xf32> to vector<4x8x1xf32>
    %290 = vector.broadcast %289 : vector<4x8x1xf32> to vector<4x8x8xf32>
    %291 = arith.subf %287, %290 : vector<4x8x8xf32>
    %292 = math.exp %291 : vector<4x8x8xf32>
    %cst_220 = arith.constant dense<0.000000e+00> : vector<4x8xf32>
    %293 = vector.multi_reduction <add>, %292, %cst_220 [2] : vector<4x8x8xf32> to vector<4x8xf32>
    %294 = vector.shape_cast %293 : vector<4x8xf32> to vector<4x8x1xf32>
    %295 = tpu.reciprocal %294 {approx = true} : vector<4x8x1xf32> -> vector<4x8x1xf32>
    %296 = vector.broadcast %295 : vector<4x8x1xf32> to vector<4x8x8xf32>
    %297 = arith.mulf %292, %296 : vector<4x8x8xf32>
    "tpu.trace_start"() <{level = 10 : i32, message = "nqk,nkd->nqd"}> : () -> ()
    %cst_221 = arith.constant dense<0.000000e+00> : vector<4x8x16xf32>
    %298 = tpu.matmul %297, %285, %cst_221 {dimension_numbers = #tpu.dot_dimension_numbers<[2], [1], [1], [2], [0, 0, 0, 1, 1, 2], [0], [0]>} : vector<4x8x8xf32>, vector<4x8x16xf32>, vector<4x8x16xf32> -> vector<4x8x16xf32>
    "tpu.trace_stop"() : () -> ()
    %299 = vector.extract_strided_slice %298 {offsets = [0, 0, 0], sizes = [2, 8, 16], strides = [1, 1, 1]} : vector<4x8x16xf32> to vector<2x8x16xf32>
    %300 = vector.extract_strided_slice %298 {offsets = [2, 0, 0], sizes = [2, 8, 16], strides = [1, 1, 1]} : vector<4x8x16xf32> to vector<2x8x16xf32>
    %301 = tpu.concatenate %299, %300 in 2 : vector<2x8x16xf32>, vector<2x8x16xf32> -> vector<2x8x32xf32>
    %302 = vector.shape_cast %301 : vector<2x8x32xf32> to vector<16x32xf32>
    %c0_222 = arith.constant 0 : index
    %c0_223 = arith.constant 0 : index
    %c0_224 = arith.constant 0 : index
    %303 = vector.load %arg4[%c0_222, %c0_223, %c0_224] : memref<2x32x32xf32, #tpu.memory_space<vmem>>, vector<1x32x32xf32>
    %304 = vector.shape_cast %303 : vector<1x32x32xf32> to vector<32x32xf32>
    %cst_225 = arith.constant dense<0.000000e+00> : vector<16x32xf32>
    %305 = tpu.matmul %302, %304, %cst_225 {dimension_numbers = #tpu.dot_dimension_numbers<[1], [0], [0], [1], [0, 0, 1, 1], [], []>} : vector<16x32xf32>, vector<32x32xf32>, vector<16x32xf32> -> vector<16x32xf32>
    %306 = vector.extract_strided_slice %263 {offsets = [1, 0], sizes = [1, 32], strides = [1, 1]} : vector<8x128xf32> to vector<1x32xf32>
    %307 = vector.broadcast %306 : vector<1x32xf32> to vector<16x32xf32>
    %308 = arith.addf %305, %307 : vector<16x32xf32>
    %309 = vector.shape_cast %308 : vector<16x32xf32> to vector<2x8x32xf32>
    %310 = arith.addf %252, %309 : vector<2x8x32xf32>
    %311 = vector.extract_strided_slice %263 {offsets = [2, 0], sizes = [1, 32], strides = [1, 1]} : vector<8x128xf32> to vector<1x32xf32>
    %312 = vector.extract_strided_slice %263 {offsets = [3, 0], sizes = [1, 32], strides = [1, 1]} : vector<8x128xf32> to vector<1x32xf32>
    %cst_226 = arith.constant dense<0.000000e+00> : vector<2x8xf32>
    %313 = vector.multi_reduction <add>, %310, %cst_226 [2] : vector<2x8x32xf32> to vector<2x8xf32>
    %314 = vector.shape_cast %313 : vector<2x8xf32> to vector<2x8x1xf32>
    %cst_227 = arith.constant 3.200000e+01 : f32
    %315 = vector.broadcast %cst_227 : f32 to vector<2x8x1xf32>
    %316 = arith.divf %314, %315 : vector<2x8x1xf32>
    %317 = vector.broadcast %316 : vector<2x8x1xf32> to vector<2x8x32xf32>
    %318 = arith.subf %310, %317 : vector<2x8x32xf32>
    %319 = arith.mulf %318, %318 : vector<2x8x32xf32>
    %cst_228 = arith.constant dense<0.000000e+00> : vector<2x8xf32>
    %320 = vector.multi_reduction <add>, %319, %cst_228 [2] : vector<2x8x32xf32> to vector<2x8xf32>
    %321 = vector.shape_cast %320 : vector<2x8xf32> to vector<2x8x1xf32>
    %cst_229 = arith.constant 3.200000e+01 : f32
    %322 = vector.broadcast %cst_229 : f32 to vector<2x8x1xf32>
    %323 = arith.divf %321, %322 : vector<2x8x1xf32>
    %324 = vector.broadcast %316 : vector<2x8x1xf32> to vector<2x8x32xf32>
    %325 = arith.subf %310, %324 : vector<2x8x32xf32>
    %cst_230 = arith.constant 9.99999996E-13 : f32
    %326 = vector.broadcast %cst_230 : f32 to vector<2x8x1xf32>
    %327 = arith.addf %323, %326 : vector<2x8x1xf32>
    %328 = math.rsqrt %327 : vector<2x8x1xf32>
    %329 = vector.broadcast %328 : vector<2x8x1xf32> to vector<2x8x32xf32>
    %330 = arith.mulf %325, %329 : vector<2x8x32xf32>
    %331 = vector.shape_cast %311 : vector<1x32xf32> to vector<1x1x32xf32>
    %332 = vector.broadcast %331 : vector<1x1x32xf32> to vector<2x8x32xf32>
    %333 = arith.mulf %330, %332 : vector<2x8x32xf32>
    %334 = vector.shape_cast %312 : vector<1x32xf32> to vector<1x1x32xf32>
    %335 = vector.broadcast %334 : vector<1x1x32xf32> to vector<2x8x32xf32>
    %336 = arith.addf %333, %335 : vector<2x8x32xf32>
    %337 = vector.shape_cast %336 : vector<2x8x32xf32> to vector<16x32xf32>
    %c0_231 = arith.constant 0 : index
    %c0_232 = arith.constant 0 : index
    %c0_233 = arith.constant 0 : index
    %338 = vector.load %arg5[%c0_231, %c0_232, %c0_233] : memref<2x32x64xf32, #tpu.memory_space<vmem>>, vector<1x32x64xf32>
    %339 = vector.shape_cast %338 : vector<1x32x64xf32> to vector<32x64xf32>
    %cst_234 = arith.constant dense<0.000000e+00> : vector<16x64xf32>
    %340 = tpu.matmul %337, %339, %cst_234 {dimension_numbers = #tpu.dot_dimension_numbers<[1], [0], [0], [1], [0, 0, 1, 1], [], []>} : vector<16x32xf32>, vector<32x64xf32>, vector<16x64xf32> -> vector<16x64xf32>
    %341 = vector.extract_strided_slice %263 {offsets = [4, 0], sizes = [1, 64], strides = [1, 1]} : vector<8x128xf32> to vector<1x64xf32>
    %342 = vector.broadcast %341 : vector<1x64xf32> to vector<16x64xf32>
    %343 = arith.addf %340, %342 : vector<16x64xf32>
    %344 = arith.mulf %343, %343 : vector<16x64xf32>
    %345 = arith.mulf %343, %344 : vector<16x64xf32>
    %cst_235 = arith.constant 4.471500e-02 : f32
    %346 = vector.broadcast %cst_235 : f32 to vector<16x64xf32>
    %347 = arith.mulf %346, %345 : vector<16x64xf32>
    %348 = arith.addf %343, %347 : vector<16x64xf32>
    %cst_236 = arith.constant 0.797884583 : f32
    %349 = vector.broadcast %cst_236 : f32 to vector<16x64xf32>
    %350 = arith.mulf %349, %348 : vector<16x64xf32>
    %351 = math.tanh %350 : vector<16x64xf32>
    %cst_237 = arith.constant 1.000000e+00 : f32
    %352 = vector.broadcast %cst_237 : f32 to vector<16x64xf32>
    %353 = arith.addf %352, %351 : vector<16x64xf32>
    %cst_238 = arith.constant 5.000000e-01 : f32
    %354 = vector.broadcast %cst_238 : f32 to vector<16x64xf32>
    %355 = arith.mulf %354, %353 : vector<16x64xf32>
    %356 = arith.mulf %343, %355 : vector<16x64xf32>
    %c0_239 = arith.constant 0 : index
    %c0_240 = arith.constant 0 : index
    %c0_241 = arith.constant 0 : index
    %357 = vector.load %arg6[%c0_239, %c0_240, %c0_241] : memref<2x64x32xf32, #tpu.memory_space<vmem>>, vector<1x64x32xf32>
    %358 = vector.shape_cast %357 : vector<1x64x32xf32> to vector<64x32xf32>
    %cst_242 = arith.constant dense<0.000000e+00> : vector<16x32xf32>
    %359 = tpu.matmul %356, %358, %cst_242 {dimension_numbers = #tpu.dot_dimension_numbers<[1], [0], [0], [1], [0, 0, 1, 1], [], []>} : vector<16x64xf32>, vector<64x32xf32>, vector<16x32xf32> -> vector<16x32xf32>
    %360 = vector.extract_strided_slice %263 {offsets = [5, 0], sizes = [1, 32], strides = [1, 1]} : vector<8x128xf32> to vector<1x32xf32>
    %361 = vector.broadcast %360 : vector<1x32xf32> to vector<16x32xf32>
    %362 = arith.addf %359, %361 : vector<16x32xf32>
    %363 = vector.shape_cast %362 : vector<16x32xf32> to vector<2x8x32xf32>
    %364 = arith.addf %336, %363 : vector<2x8x32xf32>
    %365 = vector.extract_strided_slice %263 {offsets = [6, 0], sizes = [1, 32], strides = [1, 1]} : vector<8x128xf32> to vector<1x32xf32>
    %366 = vector.extract_strided_slice %263 {offsets = [7, 0], sizes = [1, 32], strides = [1, 1]} : vector<8x128xf32> to vector<1x32xf32>
    %cst_243 = arith.constant dense<0.000000e+00> : vector<2x8xf32>
    %367 = vector.multi_reduction <add>, %364, %cst_243 [2] : vector<2x8x32xf32> to vector<2x8xf32>
    %368 = vector.shape_cast %367 : vector<2x8xf32> to vector<2x8x1xf32>
    %cst_244 = arith.constant 3.200000e+01 : f32
    %369 = vector.broadcast %cst_244 : f32 to vector<2x8x1xf32>
    %370 = arith.divf %368, %369 : vector<2x8x1xf32>
    %371 = vector.broadcast %370 : vector<2x8x1xf32> to vector<2x8x32xf32>
    %372 = arith.subf %364, %371 : vector<2x8x32xf32>
    %373 = arith.mulf %372, %372 : vector<2x8x32xf32>
    %cst_245 = arith.constant dense<0.000000e+00> : vector<2x8xf32>
    %374 = vector.multi_reduction <add>, %373, %cst_245 [2] : vector<2x8x32xf32> to vector<2x8xf32>
    %375 = vector.shape_cast %374 : vector<2x8xf32> to vector<2x8x1xf32>
    %cst_246 = arith.constant 3.200000e+01 : f32
    %376 = vector.broadcast %cst_246 : f32 to vector<2x8x1xf32>
    %377 = arith.divf %375, %376 : vector<2x8x1xf32>
    %378 = vector.broadcast %370 : vector<2x8x1xf32> to vector<2x8x32xf32>
    %379 = arith.subf %364, %378 : vector<2x8x32xf32>
    %cst_247 = arith.constant 9.99999996E-13 : f32
    %380 = vector.broadcast %cst_247 : f32 to vector<2x8x1xf32>
    %381 = arith.addf %377, %380 : vector<2x8x1xf32>
    %382 = math.rsqrt %381 : vector<2x8x1xf32>
    %383 = vector.broadcast %382 : vector<2x8x1xf32> to vector<2x8x32xf32>
    %384 = arith.mulf %379, %383 : vector<2x8x32xf32>
    %385 = vector.shape_cast %365 : vector<1x32xf32> to vector<1x1x32xf32>
    %386 = vector.broadcast %385 : vector<1x1x32xf32> to vector<2x8x32xf32>
    %387 = arith.mulf %384, %386 : vector<2x8x32xf32>
    %388 = vector.shape_cast %366 : vector<1x32xf32> to vector<1x1x32xf32>
    %389 = vector.broadcast %388 : vector<1x1x32xf32> to vector<2x8x32xf32>
    %390 = arith.addf %387, %389 : vector<2x8x32xf32>
    %c1_248 = arith.constant 1 : index
    %c0_249 = arith.constant 0 : index
    %c0_250 = arith.constant 0 : index
    %391 = vector.load %arg7[%c1_248, %c0_249, %c0_250] : memref<2x8x128xf32, #tpu.memory_space<vmem>>, vector<1x8x128xf32>
    %392 = vector.shape_cast %391 : vector<1x8x128xf32> to vector<8x128xf32>
    %393 = vector.shape_cast %390 : vector<2x8x32xf32> to vector<16x32xf32>
    %c1_251 = arith.constant 1 : index
    %c0_252 = arith.constant 0 : index
    %c0_253 = arith.constant 0 : index
    %394 = vector.load %arg3[%c1_251, %c0_252, %c0_253] : memref<2x32x96xf32, #tpu.memory_space<vmem>>, vector<1x32x96xf32>
    %395 = vector.shape_cast %394 : vector<1x32x96xf32> to vector<32x96xf32>
    %cst_254 = arith.constant dense<0.000000e+00> : vector<16x96xf32>
    %396 = tpu.matmul %393, %395, %cst_254 {dimension_numbers = #tpu.dot_dimension_numbers<[1], [0], [0], [1], [0, 0, 1, 1], [], []>} : vector<16x32xf32>, vector<32x96xf32>, vector<16x96xf32> -> vector<16x96xf32>
    %397 = vector.extract_strided_slice %392 {offsets = [0, 0], sizes = [1, 96], strides = [1, 1]} : vector<8x128xf32> to vector<1x96xf32>
    %398 = vector.broadcast %397 : vector<1x96xf32> to vector<16x96xf32>
    %399 = arith.addf %396, %398 : vector<16x96xf32>
    %400 = vector.extract_strided_slice %399 {offsets = [0, 0], sizes = [16, 32], strides = [1, 1]} : vector<16x96xf32> to vector<16x32xf32>
    %401 = vector.shape_cast %400 : vector<16x32xf32> to vector<2x8x32xf32>
    %402 = vector.extract_strided_slice %399 {offsets = [0, 32], sizes = [16, 32], strides = [1, 1]} : vector<16x96xf32> to vector<16x32xf32>
    %403 = vector.shape_cast %402 : vector<16x32xf32> to vector<2x8x32xf32>
    %404 = vector.extract_strided_slice %399 {offsets = [0, 64], sizes = [16, 32], strides = [1, 1]} : vector<16x96xf32> to vector<16x32xf32>
    %405 = vector.shape_cast %404 : vector<16x32xf32> to vector<2x8x32xf32>
    %406 = vector.extract_strided_slice %401 {offsets = [0, 0, 0], sizes = [2, 8, 16], strides = [1, 1, 1]} : vector<2x8x32xf32> to vector<2x8x16xf32>
    %407 = vector.extract_strided_slice %401 {offsets = [0, 0, 16], sizes = [2, 8, 16], strides = [1, 1, 1]} : vector<2x8x32xf32> to vector<2x8x16xf32>
    %408 = tpu.concatenate %406, %407 in 0 : vector<2x8x16xf32>, vector<2x8x16xf32> -> vector<4x8x16xf32>
    %409 = vector.extract_strided_slice %403 {offsets = [0, 0, 0], sizes = [2, 8, 16], strides = [1, 1, 1]} : vector<2x8x32xf32> to vector<2x8x16xf32>
    %410 = vector.extract_strided_slice %403 {offsets = [0, 0, 16], sizes = [2, 8, 16], strides = [1, 1, 1]} : vector<2x8x32xf32> to vector<2x8x16xf32>
    %411 = tpu.concatenate %409, %410 in 0 : vector<2x8x16xf32>, vector<2x8x16xf32> -> vector<4x8x16xf32>
    %412 = vector.extract_strided_slice %405 {offsets = [0, 0, 0], sizes = [2, 8, 16], strides = [1, 1, 1]} : vector<2x8x32xf32> to vector<2x8x16xf32>
    %413 = vector.extract_strided_slice %405 {offsets = [0, 0, 16], sizes = [2, 8, 16], strides = [1, 1, 1]} : vector<2x8x32xf32> to vector<2x8x16xf32>
    %414 = tpu.concatenate %412, %413 in 0 : vector<2x8x16xf32>, vector<2x8x16xf32> -> vector<4x8x16xf32>
    "tpu.trace_start"() <{level = 10 : i32, message = "nqd,nkd->nqk"}> : () -> ()
    %cst_255 = arith.constant dense<0.000000e+00> : vector<4x8x8xf32>
    %415 = tpu.matmul %408, %411, %cst_255 {dimension_numbers = #tpu.dot_dimension_numbers<[2], [2], [1], [1], [0, 0, 0, 1, 1, 1], [0], [0]>} : vector<4x8x16xf32>, vector<4x8x16xf32>, vector<4x8x8xf32> -> vector<4x8x8xf32>
    "tpu.trace_stop"() : () -> ()
    %416 = arith.addf %415, %261 : vector<4x8x8xf32>
    %cst_256 = arith.constant dense<0xFF800000> : vector<4x8xf32>
    %417 = vector.multi_reduction <maximumf>, %416, %cst_256 [2] : vector<4x8x8xf32> to vector<4x8xf32>
    %418 = vector.shape_cast %417 : vector<4x8xf32> to vector<4x8x1xf32>
    %419 = vector.broadcast %418 : vector<4x8x1xf32> to vector<4x8x8xf32>
    %420 = arith.subf %416, %419 : vector<4x8x8xf32>
    %421 = math.exp %420 : vector<4x8x8xf32>
    %cst_257 = arith.constant dense<0.000000e+00> : vector<4x8xf32>
    %422 = vector.multi_reduction <add>, %421, %cst_257 [2] : vector<4x8x8xf32> to vector<4x8xf32>
    %423 = vector.shape_cast %422 : vector<4x8xf32> to vector<4x8x1xf32>
    %424 = tpu.reciprocal %423 {approx = true} : vector<4x8x1xf32> -> vector<4x8x1xf32>
    %425 = vector.broadcast %424 : vector<4x8x1xf32> to vector<4x8x8xf32>
    %426 = arith.mulf %421, %425 : vector<4x8x8xf32>
    "tpu.trace_start"() <{level = 10 : i32, message = "nqk,nkd->nqd"}> : () -> ()
    %cst_258 = arith.constant dense<0.000000e+00> : vector<4x8x16xf32>
    %427 = tpu.matmul %426, %414, %cst_258 {dimension_numbers = #tpu.dot_dimension_numbers<[2], [1], [1], [2], [0, 0, 0, 1, 1, 2], [0], [0]>} : vector<4x8x8xf32>, vector<4x8x16xf32>, vector<4x8x16xf32> -> vector<4x8x16xf32>
    "tpu.trace_stop"() : () -> ()
    %428 = vector.extract_strided_slice %427 {offsets = [0, 0, 0], sizes = [2, 8, 16], strides = [1, 1, 1]} : vector<4x8x16xf32> to vector<2x8x16xf32>
    %429 = vector.extract_strided_slice %427 {offsets = [2, 0, 0], sizes = [2, 8, 16], strides = [1, 1, 1]} : vector<4x8x16xf32> to vector<2x8x16xf32>
    %430 = tpu.concatenate %428, %429 in 2 : vector<2x8x16xf32>, vector<2x8x16xf32> -> vector<2x8x32xf32>
    %431 = vector.shape_cast %430 : vector<2x8x32xf32> to vector<16x32xf32>
    %c1_259 = arith.constant 1 : index
    %c0_260 = arith.constant 0 : index
    %c0_261 = arith.constant 0 : index
    %432 = vector.load %arg4[%c1_259, %c0_260, %c0_261] : memref<2x32x32xf32, #tpu.memory_space<vmem>>, vector<1x32x32xf32>
    %433 = vector.shape_cast %432 : vector<1x32x32xf32> to vector<32x32xf32>
    %cst_262 = arith.constant dense<0.000000e+00> : vector<16x32xf32>
    %434 = tpu.matmul %431, %433, %cst_262 {dimension_numbers = #tpu.dot_dimension_numbers<[1], [0], [0], [1], [0, 0, 1, 1], [], []>} : vector<16x32xf32>, vector<32x32xf32>, vector<16x32xf32> -> vector<16x32xf32>
    %435 = vector.extract_strided_slice %392 {offsets = [1, 0], sizes = [1, 32], strides = [1, 1]} : vector<8x128xf32> to vector<1x32xf32>
    %436 = vector.broadcast %435 : vector<1x32xf32> to vector<16x32xf32>
    %437 = arith.addf %434, %436 : vector<16x32xf32>
    %438 = vector.shape_cast %437 : vector<16x32xf32> to vector<2x8x32xf32>
    %439 = arith.addf %390, %438 : vector<2x8x32xf32>
    %440 = vector.extract_strided_slice %392 {offsets = [2, 0], sizes = [1, 32], strides = [1, 1]} : vector<8x128xf32> to vector<1x32xf32>
    %441 = vector.extract_strided_slice %392 {offsets = [3, 0], sizes = [1, 32], strides = [1, 1]} : vector<8x128xf32> to vector<1x32xf32>
    %cst_263 = arith.constant dense<0.000000e+00> : vector<2x8xf32>
    %442 = vector.multi_reduction <add>, %439, %cst_263 [2] : vector<2x8x32xf32> to vector<2x8xf32>
    %443 = vector.shape_cast %442 : vector<2x8xf32> to vector<2x8x1xf32>
    %cst_264 = arith.constant 3.200000e+01 : f32
    %444 = vector.broadcast %cst_264 : f32 to vector<2x8x1xf32>
    %445 = arith.divf %443, %444 : vector<2x8x1xf32>
    %446 = vector.broadcast %445 : vector<2x8x1xf32> to vector<2x8x32xf32>
    %447 = arith.subf %439, %446 : vector<2x8x32xf32>
    %448 = arith.mulf %447, %447 : vector<2x8x32xf32>
    %cst_265 = arith.constant dense<0.000000e+00> : vector<2x8xf32>
    %449 = vector.multi_reduction <add>, %448, %cst_265 [2] : vector<2x8x32xf32> to vector<2x8xf32>
    %450 = vector.shape_cast %449 : vector<2x8xf32> to vector<2x8x1xf32>
    %cst_266 = arith.constant 3.200000e+01 : f32
    %451 = vector.broadcast %cst_266 : f32 to vector<2x8x1xf32>
    %452 = arith.divf %450, %451 : vector<2x8x1xf32>
    %453 = vector.broadcast %445 : vector<2x8x1xf32> to vector<2x8x32xf32>
    %454 = arith.subf %439, %453 : vector<2x8x32xf32>
    %cst_267 = arith.constant 9.99999996E-13 : f32
    %455 = vector.broadcast %cst_267 : f32 to vector<2x8x1xf32>
    %456 = arith.addf %452, %455 : vector<2x8x1xf32>
    %457 = math.rsqrt %456 : vector<2x8x1xf32>
    %458 = vector.broadcast %457 : vector<2x8x1xf32> to vector<2x8x32xf32>
    %459 = arith.mulf %454, %458 : vector<2x8x32xf32>
    %460 = vector.shape_cast %440 : vector<1x32xf32> to vector<1x1x32xf32>
    %461 = vector.broadcast %460 : vector<1x1x32xf32> to vector<2x8x32xf32>
    %462 = arith.mulf %459, %461 : vector<2x8x32xf32>
    %463 = vector.shape_cast %441 : vector<1x32xf32> to vector<1x1x32xf32>
    %464 = vector.broadcast %463 : vector<1x1x32xf32> to vector<2x8x32xf32>
    %465 = arith.addf %462, %464 : vector<2x8x32xf32>
    %466 = vector.shape_cast %465 : vector<2x8x32xf32> to vector<16x32xf32>
    %c1_268 = arith.constant 1 : index
    %c0_269 = arith.constant 0 : index
    %c0_270 = arith.constant 0 : index
    %467 = vector.load %arg5[%c1_268, %c0_269, %c0_270] : memref<2x32x64xf32, #tpu.memory_space<vmem>>, vector<1x32x64xf32>
    %468 = vector.shape_cast %467 : vector<1x32x64xf32> to vector<32x64xf32>
    %cst_271 = arith.constant dense<0.000000e+00> : vector<16x64xf32>
    %469 = tpu.matmul %466, %468, %cst_271 {dimension_numbers = #tpu.dot_dimension_numbers<[1], [0], [0], [1], [0, 0, 1, 1], [], []>} : vector<16x32xf32>, vector<32x64xf32>, vector<16x64xf32> -> vector<16x64xf32>
    %470 = vector.extract_strided_slice %392 {offsets = [4, 0], sizes = [1, 64], strides = [1, 1]} : vector<8x128xf32> to vector<1x64xf32>
    %471 = vector.broadcast %470 : vector<1x64xf32> to vector<16x64xf32>
    %472 = arith.addf %469, %471 : vector<16x64xf32>
    %473 = arith.mulf %472, %472 : vector<16x64xf32>
    %474 = arith.mulf %472, %473 : vector<16x64xf32>
    %cst_272 = arith.constant 4.471500e-02 : f32
    %475 = vector.broadcast %cst_272 : f32 to vector<16x64xf32>
    %476 = arith.mulf %475, %474 : vector<16x64xf32>
    %477 = arith.addf %472, %476 : vector<16x64xf32>
    %cst_273 = arith.constant 0.797884583 : f32
    %478 = vector.broadcast %cst_273 : f32 to vector<16x64xf32>
    %479 = arith.mulf %478, %477 : vector<16x64xf32>
    %480 = math.tanh %479 : vector<16x64xf32>
    %cst_274 = arith.constant 1.000000e+00 : f32
    %481 = vector.broadcast %cst_274 : f32 to vector<16x64xf32>
    %482 = arith.addf %481, %480 : vector<16x64xf32>
    %cst_275 = arith.constant 5.000000e-01 : f32
    %483 = vector.broadcast %cst_275 : f32 to vector<16x64xf32>
    %484 = arith.mulf %483, %482 : vector<16x64xf32>
    %485 = arith.mulf %472, %484 : vector<16x64xf32>
    %c1_276 = arith.constant 1 : index
    %c0_277 = arith.constant 0 : index
    %c0_278 = arith.constant 0 : index
    %486 = vector.load %arg6[%c1_276, %c0_277, %c0_278] : memref<2x64x32xf32, #tpu.memory_space<vmem>>, vector<1x64x32xf32>
    %487 = vector.shape_cast %486 : vector<1x64x32xf32> to vector<64x32xf32>
    %cst_279 = arith.constant dense<0.000000e+00> : vector<16x32xf32>
    %488 = tpu.matmul %485, %487, %cst_279 {dimension_numbers = #tpu.dot_dimension_numbers<[1], [0], [0], [1], [0, 0, 1, 1], [], []>} : vector<16x64xf32>, vector<64x32xf32>, vector<16x32xf32> -> vector<16x32xf32>
    %489 = vector.extract_strided_slice %392 {offsets = [5, 0], sizes = [1, 32], strides = [1, 1]} : vector<8x128xf32> to vector<1x32xf32>
    %490 = vector.broadcast %489 : vector<1x32xf32> to vector<16x32xf32>
    %491 = arith.addf %488, %490 : vector<16x32xf32>
    %492 = vector.shape_cast %491 : vector<16x32xf32> to vector<2x8x32xf32>
    %493 = arith.addf %465, %492 : vector<2x8x32xf32>
    %494 = vector.extract_strided_slice %392 {offsets = [6, 0], sizes = [1, 32], strides = [1, 1]} : vector<8x128xf32> to vector<1x32xf32>
    %495 = vector.extract_strided_slice %392 {offsets = [7, 0], sizes = [1, 32], strides = [1, 1]} : vector<8x128xf32> to vector<1x32xf32>
    %cst_280 = arith.constant dense<0.000000e+00> : vector<2x8xf32>
    %496 = vector.multi_reduction <add>, %493, %cst_280 [2] : vector<2x8x32xf32> to vector<2x8xf32>
    %497 = vector.shape_cast %496 : vector<2x8xf32> to vector<2x8x1xf32>
    %cst_281 = arith.constant 3.200000e+01 : f32
    %498 = vector.broadcast %cst_281 : f32 to vector<2x8x1xf32>
    %499 = arith.divf %497, %498 : vector<2x8x1xf32>
    %500 = vector.broadcast %499 : vector<2x8x1xf32> to vector<2x8x32xf32>
    %501 = arith.subf %493, %500 : vector<2x8x32xf32>
    %502 = arith.mulf %501, %501 : vector<2x8x32xf32>
    %cst_282 = arith.constant dense<0.000000e+00> : vector<2x8xf32>
    %503 = vector.multi_reduction <add>, %502, %cst_282 [2] : vector<2x8x32xf32> to vector<2x8xf32>
    %504 = vector.shape_cast %503 : vector<2x8xf32> to vector<2x8x1xf32>
    %cst_283 = arith.constant 3.200000e+01 : f32
    %505 = vector.broadcast %cst_283 : f32 to vector<2x8x1xf32>
    %506 = arith.divf %504, %505 : vector<2x8x1xf32>
    %507 = vector.broadcast %499 : vector<2x8x1xf32> to vector<2x8x32xf32>
    %508 = arith.subf %493, %507 : vector<2x8x32xf32>
    %cst_284 = arith.constant 9.99999996E-13 : f32
    %509 = vector.broadcast %cst_284 : f32 to vector<2x8x1xf32>
    %510 = arith.addf %506, %509 : vector<2x8x1xf32>
    %511 = math.rsqrt %510 : vector<2x8x1xf32>
    %512 = vector.broadcast %511 : vector<2x8x1xf32> to vector<2x8x32xf32>
    %513 = arith.mulf %508, %512 : vector<2x8x32xf32>
    %514 = vector.shape_cast %494 : vector<1x32xf32> to vector<1x1x32xf32>
    %515 = vector.broadcast %514 : vector<1x1x32xf32> to vector<2x8x32xf32>
    %516 = arith.mulf %513, %515 : vector<2x8x32xf32>
    %517 = vector.shape_cast %495 : vector<1x32xf32> to vector<1x1x32xf32>
    %518 = vector.broadcast %517 : vector<1x1x32xf32> to vector<2x8x32xf32>
    %519 = arith.addf %516, %518 : vector<2x8x32xf32>
    %520 = vector.extract_strided_slice %519 {offsets = [0, 0, 0], sizes = [2, 1, 32], strides = [1, 1, 1]} : vector<2x8x32xf32> to vector<2x1x32xf32>
    %521 = vector.shape_cast %520 : vector<2x1x32xf32> to vector<2x32xf32>
    %c0_285 = arith.constant 0 : index
    %c0_286 = arith.constant 0 : index
    %522 = vector.load %arg9[%c0_285, %c0_286] : memref<32x32xf32, #tpu.memory_space<vmem>>, vector<32x32xf32>
    %cst_287 = arith.constant dense<0.000000e+00> : vector<2x32xf32>
    %523 = tpu.matmul %521, %522, %cst_287 {dimension_numbers = #tpu.dot_dimension_numbers<[1], [0], [0], [1], [0, 0, 1, 1], [], []>} : vector<2x32xf32>, vector<32x32xf32>, vector<2x32xf32> -> vector<2x32xf32>
    %524 = vector.extract_strided_slice %224 {offsets = [2, 0], sizes = [1, 32], strides = [1, 1]} : vector<8x128xf32> to vector<1x32xf32>
    %525 = vector.broadcast %524 : vector<1x32xf32> to vector<2x32xf32>
    %526 = arith.addf %523, %525 : vector<2x32xf32>
    %527 = math.tanh %526 : vector<2x32xf32>
    %c0_288 = arith.constant 0 : index
    %c0_289 = arith.constant 0 : index
    %528 = vector.load %arg10[%c0_288, %c0_289] : memref<32x128xf32, #tpu.memory_space<vmem>>, vector<32x128xf32>
    %cst_290 = arith.constant dense<0.000000e+00> : vector<2x128xf32>
    %529 = tpu.matmul %527, %528, %cst_290 {dimension_numbers = #tpu.dot_dimension_numbers<[1], [0], [0], [1], [0, 0, 1, 1], [], []>} : vector<2x32xf32>, vector<32x128xf32>, vector<2x128xf32> -> vector<2x128xf32>
    %530 = vector.extract_strided_slice %224 {offsets = [3, 0], sizes = [1, 128], strides = [1, 1]} : vector<8x128xf32> to vector<1x128xf32>
    %531 = vector.broadcast %530 : vector<1x128xf32> to vector<2x128xf32>
    %532 = arith.addf %529, %531 : vector<2x128xf32>
    %cst_291 = arith.constant 0.000000e+00 : f32
    %533 = vector.broadcast %cst_291 : f32 to vector<6x128xf32>
    %534 = tpu.concatenate %532, %533 in 0 : vector<2x128xf32>, vector<6x128xf32> -> vector<8x128xf32>
    %c0_292 = arith.constant 0 : index
    %c0_293 = arith.constant 0 : index
    %535 = vector.load %arg11[%c0_292, %c0_293] : memref<8x128xf32, #tpu.memory_space<vmem>>, vector<8x128xf32>
    tpu.vector_store %arg11[%c0_292, %c0_293], %534 {strides = array<i32>} : memref<8x128xf32, #tpu.memory_space<vmem>>, vector<8x128xf32>,
    return
  }
}

</mosaic_0001>

<bundles_post_ra>
// kernel: dann_forward.1
= control target key start
LH: loop header
LB: loop body
LE: loop exit
PB: predicated region body
PF: predicated region fallthrough
CT: control target
= control target key end

     0   :  { %16 = vsyncpa [#allocation5], 0  ;;  %s4144_s0 = inlined_call_operand.vmem [shape: s32[2,16], index: 0, kind: input, shape index: {}]   ;;  %s4145_s1 = inlined_call_operand.vmem [shape: f32[2,8], index: 1, kind: input, shape index: {}]   ;;  %s4146_s2 = inlined_call_operand.vmem [shape: f32[98,1,32], index: 2, kind: input, shape index: {}]   ;;  %s4147_s3 = inlined_call_operand.vmem [shape: f32[2,32,96], index: 3, kind: input, shape index: {}]   ;;  %s4148_s4 = inlined_call_operand.vmem [shape: f32[2,32,32], index: 4, kind: input, shape index: {}]   ;;  %s4149_s5 = inlined_call_operand.vmem [shape: f32[2,32,64], index: 5, kind: input, shape index: {}]   ;;  %s4150_s6 = inlined_call_operand.vmem [shape: f32[2,64,32], index: 6, kind: input, shape index: {}]   ;;  %s4151_s7 = inlined_call_operand.hbm [shape: f32[2,8,128], index: 7, kind: input, shape index: {}]   ;;  %s4152_s8 = inlined_call_operand.vmem [shape: f32[8,128], index: 8, kind: input, shape index: {}]   ;;  %s4153_s9 = inlined_call_operand.vmem [shape: f32[32,32], index: 9, kind: input, shape index: {}]   ;;  %s4154_s10 = inlined_call_operand.vmem [shape: f32[32,128], index: 10, kind: input, shape index: {}]   ;;  %s4155_s11 = inlined_call_operand.vmem [shape: f32[8,128], index: 11, kind: output, shape index: {}]  }
   0x1   :  { %s24_s19 = sshll.u32 %s4144_s0, 4  ;;  %s25_s19 = int_to_ptr.vmem [resolvable:$true] %s24_s19 }
   0x2   :  { %17 = vsyncpa [#allocation4], 0  ;;  %s3318_s20 = scalar_lea.vmem %s25_s19, 32  ;;  %p3323_p1 = scmp.lt.s32.totalorder %s25_s19, %s25_s19 }
   0x3   :  { %p3319_p0 = scmp.ne.s32.totalorder %s25_s19, %s3318_s20  ;;  %p3324_p2 = scmp.lt.s32.totalorder %s3318_s20, %s3318_s20 }
   0x5   :  { %p3325_p3 = por %p3324_p2, %p3323_p1 }
   0x7   :  { %p3326_p4 = pnand %p3325_p3, %p3319_p0 }
   0x9   :  { %3329 = shalt.err (!%p3326_p4)
}
   0xa   :  { %s3354_s21 = smov [#allocation3]   ;;  %s3355_s22 = smov [#allocation6]  }
   0xb   :  { %27 = dma.vmem_to_smem %s25_s19, 32, %s3354_s21, [#allocation5]  }
   0xc   :  { %s45_s23 = sshll.u32 %s3355_s22, 4  ;;  %s46_s23 = int_to_ptr.vmem [resolvable:$true] %s45_s23 }
   0xd   :  { %s3338_s24 = scalar_lea.vmem %s46_s23, 256  ;;  %p3343_p6 = scmp.lt.s32.totalorder %s46_s23, %s46_s23 }
   0xe   :  { %p3339_p5 = scmp.ne.s32.totalorder %s46_s23, %s3338_s24  ;;  %p3344_p7 = scmp.lt.s32.totalorder %s3338_s24, %s3338_s24 }
  0x10   :  { %p3345_p8 = por %p3344_p7, %p3343_p6 }
  0x12   :  { %p3346_p9 = pnand %p3345_p8, %p3339_p5 }
  0x14   :  { %3349 = shalt.err (!%p3346_p9)
}
  0x15   :  { %s3356_s0 = smov 128   ;;  %s3357_s25 = smov 8  }
  0x16   :  { %51 = dma.hbm_to_vmem [thread:$0]  %s4151_s7, 256, %s46_s23, [#allocation4], %s3356_s0, %s3356_s0, %s3357_s25  }
  0x17   :  { %3350 = dma.done.wait [#allocation5], 32  }
  0x18   :  { %3351 = vsyncadd [#allocation5], 4294967264 }
  0x19   :  { %3352 = dma.done.wait [#allocation4], 256  }
  0x1a   :  { %3353 = vsyncadd [#allocation4], 4294967040 }
  0x1b   :  { %64 = sfence }
  0x1c   :  { %s65_s28 = sld [smem:[#allocation3]]  ;;  %v2816_v0 = vld [vmem:[%s4146_s2 + $0x40] sm:$0x1]  ;;  %v2820_v2 = vld [vmem:[%s4146_s2 + $0x41] sm:$0x1]  ;;  %vm76_vm0 = vcmask 253952  }
  0x1d   :  { %s2815_s29 = sld [smem:[#allocation3 + $0x80]]  ;;  %v2824_v6 = vld [vmem:[%s4146_s2 + $0x42] sm:$0x1]  ;;  %v2828_v11 = vld [vmem:[%s4146_s2 + $0x43] sm:$0x1]  ;;  %vm253_vm1 = vcmask 261120  }
  0x1e   :  { %s2818_s30 = sld [smem:[#allocation3 + $0x1]]  ;;  %v2832_v16 = vld [vmem:[%s4146_s2 + $0x44] sm:$0x1]  ;;  %v2836_v21 = vld [vmem:[%s4146_s2 + $0x45] sm:$0x1]  ;;  %vm3359_vm2 = vmmov 0  }
  0x1f   :  { %s2819_s12 = sld [smem:[#allocation3 + $0x81]]  ;;  %v2840_v26 = vld [vmem:[%s4146_s2 + $0x46] sm:$0x1]  ;;  %v2844_v31 = vld [vmem:[%s4146_s2 + $0x47] sm:$0x1]  ;;  %vm427_vm3 = vcmask 130048  }
  0x20   :  { %s2822_s13 = sld [smem:[#allocation3 + $0x2]]  ;;  %v2848_v36 = vld [vmem:[%s4146_s2 + $0x40] sm:$0x1]  ;;  %v2852_v41 = vld [vmem:[%s4146_s2 + $0x41] sm:$0x1]  ;;  %vm730_vm4 = vcmask 64512  }
  0x21   :  { %s2823_s16 = sld [smem:[#allocation3 + $0x82]]  ;;  %v2856_v46 = vld [vmem:[%s4146_s2 + $0x42] sm:$0x1]  ;;  %v2860_v51 = vld [vmem:[%s4146_s2 + $0x43] sm:$0x1]  ;;  %vm1337_vm5 = vcmask 523264  }
  0x22   :  { %s67_s19 = scalar_lea.vmem %s4146_s2, %s65_s28  ;;  %s3437_s7 = sld [smem:[#allocation3 + $0x3]]  ;;  %v2864_v56 = vld [vmem:[%s4146_s2 + $0x44] sm:$0x1]  ;;  %v2868_v61 = vld [vmem:[%s4146_s2 + $0x45] sm:$0x1]  ;;  %vm2602_vm6 = vcmask 1041409  }
  0x23   :  { %v68_v1 = vld [vmem:[%s67_s19] sm:$0x1]  ;;  %s2768_s22 = scalar_lea.vmem %s4146_s2, %s2815_s29  ;;  %s3445_s0 = sld [smem:[#allocation3 + $0x83]]  ;;  %vm2758_vm7 = vcmask 1041408  }
  0x24   :  { %v71_v3 = vadd.f32 %v2816_v0, %v68_v1  ;;  %v2817_v4 = vld [vmem:[%s2768_s22 + $0x60] sm:$0x1]  ;;  %s80_s27 = scalar_lea.vmem %s4146_s2, %s2818_s30  ;;  %s3450_s28 = sld [smem:[#allocation3 + $0x4]] }
  0x25   :  { %v81_v5 = vld [vmem:[%s80_s27] sm:$0x1]  ;;  %s2771_s29 = scalar_lea.vmem %s4146_s2, %s2819_s12  ;;  %s3458_s19 = sld [smem:[#allocation3 + $0x84]] }
  0x26   :  { %v75_v7 = vadd.f32 %v2817_v4, %v71_v3  ;;  %v84_v8 = vadd.f32 %v2820_v2, %v81_v5  ;;  %v2821_v9 = vld [vmem:[%s2771_s29 + $0x60] sm:$0x1]  ;;  %s92_s21 = scalar_lea.vmem %s4146_s2, %s2822_s13  ;;  %s3463_s22 = sld [smem:[#allocation3 + $0x5]]  ;;  %v2872_v3 = vld [vmem:[%s4146_s2 + $0x46] sm:$0x1] }
  0x27   :  { %v93_v10 = vld [vmem:[%s92_s21] sm:$0x1]  ;;  %s2774_s24 = scalar_lea.vmem %s4146_s2, %s2823_s16  ;;  %s3471_s27 = sld [smem:[#allocation3 + $0x85]] }
  0x28   :  { %77 = vst.msk [vmem:[#allocation2] sm:$0x1] %vm76_vm0, %v75_v7  ;;  %v88_v12 = vadd.f32 %v2821_v9, %v84_v8  ;;  %v96_v13 = vadd.f32 %v2824_v6, %v93_v10  ;;  %v2825_v14 = vld [vmem:[%s2774_s24 + $0x60] sm:$0x1]  ;;  %s104_s15 = scalar_lea.vmem %s4146_s2, %s3437_s7  ;;  %s3478_s29 = sld [smem:[#allocation3 + $0x6]] }
  0x29   :  { %v105_v15 = vld [vmem:[%s104_s15] sm:$0x1]  ;;  %s2777_s18 = scalar_lea.vmem %s4146_s2, %s3445_s0  ;;  %s3487_s21 = sld [smem:[#allocation3 + $0x86]]  ;;  %v2876_v9 = vld [vmem:[%s4146_s2 + $0x47] sm:$0x1] }
  0x2a   :  { %89 = vst.msk [vmem:[#allocation2 + $0x1] sm:$0x1] %vm76_vm0, %v88_v12  ;;  %v100_v17 = vadd.f32 %v2825_v14, %v96_v13  ;;  %v108_v18 = vadd.f32 %v2828_v11, %v105_v15  ;;  %v2829_v19 = vld [vmem:[%s2777_s18 + $0x60] sm:$0x1]  ;;  %s116_s12 = scalar_lea.vmem %s4146_s2, %s3450_s28  ;;  %s3494_s24 = sld [smem:[#allocation3 + $0x7]] }
  0x2b   :  { %v117_v20 = vld [vmem:[%s116_s12] sm:$0x1]  ;;  %s2780_s26 = scalar_lea.vmem %s4146_s2, %s3458_s19  ;;  %s3503_s15 = sld [smem:[#allocation3 + $0x87]] }
  0x2c   :  { %101 = vst.msk [vmem:[#allocation2 + $0x2] sm:$0x1] %vm76_vm0, %v100_v17  ;;  %v112_v22 = vadd.f32 %v2829_v19, %v108_v18  ;;  %v120_v23 = vadd.f32 %v2832_v16, %v117_v20  ;;  %v2833_v24 = vld [vmem:[%s2780_s26 + $0x60] sm:$0x1]  ;;  %s128_s17 = scalar_lea.vmem %s4146_s2, %s3463_s22  ;;  %s3510_s18 = sld [smem:[#allocation3 + $0x8]] }
  0x2d   :  { %v129_v25 = vld [vmem:[%s128_s17] sm:$0x1]  ;;  %s2783_s30 = scalar_lea.vmem %s4146_s2, %s3471_s27  ;;  %s3519_s12 = sld [smem:[#allocation3 + $0x88]] }
  0x2e   :  { %113 = vst.msk [vmem:[#allocation2 + $0x3] sm:$0x1] %vm76_vm0, %v112_v22  ;;  %v124_v27 = vadd.f32 %v2833_v24, %v120_v23  ;;  %v132_v28 = vadd.f32 %v2836_v21, %v129_v25  ;;  %v2837_v29 = vld [vmem:[%s2783_s30 + $0x60] sm:$0x1]  ;;  %s140_s25 = scalar_lea.vmem %s4146_s2, %s3478_s29  ;;  %s3526_s26 = sld [smem:[#allocation3 + $0x9]] }
  0x2f   :  { %v141_v30 = vld [vmem:[%s140_s25] sm:$0x1]  ;;  %s2786_s14 = scalar_lea.vmem %s4146_s2, %s3487_s21  ;;  %s3535_s17 = sld [smem:[#allocation3 + $0x89]] }
  0x30   :  { %125 = vst.msk [vmem:[#allocation2 + $0x4] sm:$0x1] %vm76_vm0, %v124_v27  ;;  %v136_v32 = vadd.f32 %v2837_v29, %v132_v28  ;;  %v144_v33 = vadd.f32 %v2840_v26, %v141_v30  ;;  %v2841_v34 = vld [vmem:[%s2786_s14 + $0x60] sm:$0x1]  ;;  %s152_s20 = scalar_lea.vmem %s4146_s2, %s3494_s24  ;;  %s3542_s30 = sld [smem:[#allocation3 + $0xa]]  ;;  %v333_v30 = vld [vmem:[%s4147_s3 + $0x18] sm:$0xff] }
  0x31   :  { %v153_v35 = vld [vmem:[%s152_s20] sm:$0x1]  ;;  %s2789_s23 = scalar_lea.vmem %s4146_s2, %s3503_s15  ;;  %s3551_s25 = sld [smem:[#allocation3 + $0x8a]]  ;;  %3038 = vmatprep.subr.mxu0 %v333_v30 }
  0x32   :  { %137 = vst.msk [vmem:[#allocation2 + $0x5] sm:$0x1] %vm76_vm0, %v136_v32  ;;  %v148_v37 = vadd.f32 %v2841_v34, %v144_v33  ;;  %v156_v38 = vadd.f32 %v2844_v31, %v153_v35  ;;  %v2845_v39 = vld [vmem:[%s2789_s23 + $0x60] sm:$0x1]  ;;  %s164_s13 = scalar_lea.vmem %s4146_s2, %s3510_s18  ;;  %s3558_s14 = sld [smem:[#allocation3 + $0xb]]  ;;  %v332_v31 = vld [vmem:[%s4147_s3 + $0x10] sm:$0xff]  ;;  %3039 = vmatpush3.msra.mxu0 %v333_v30 }
  0x33   :  { %v165_v40 = vld [vmem:[%s164_s13] sm:$0x1]  ;;  %s2792_s16 = scalar_lea.vmem %s4146_s2, %s3519_s12  ;;  %s3567_s20 = sld [smem:[#allocation3 + $0x8b]]  ;;  %v331_v32 = vld [vmem:[%s4147_s3 + $0x8] sm:$0xff]  ;;  %3040 = vmatprep.subr.mxu0 %v332_v31 }
  0x34   :  { %149 = vst.msk [vmem:[#allocation2 + $0x6] sm:$0x1] %vm76_vm0, %v148_v37  ;;  %v160_v42 = vadd.f32 %v2845_v39, %v156_v38  ;;  %v167_v43 = vadd.f32 %v2848_v36, %v165_v40  ;;  %v2849_v44 = vld [vmem:[%s2792_s16 + $0x60] sm:$0x1]  ;;  %s175_s7 = scalar_lea.vmem %s4146_s2, %s3526_s26  ;;  %s3574_s23 = sld [smem:[#allocation3 + $0xc]]  ;;  %3041 = vmatpush3.msra.mxu0 %v332_v31  ;;  %v281_v37 = vlaneseq }
  0x35   :  { %v176_v45 = vld [vmem:[%s175_s7] sm:$0x1]  ;;  %s2795_s0 = scalar_lea.vmem %s4146_s2, %s3535_s17  ;;  %s3583_s13 = sld [smem:[#allocation3 + $0x8c]]  ;;  %3042 = vmatprep.subr.mxu0 %v331_v32 }
  0x36   :  { %161 = vst.msk [vmem:[#allocation2 + $0x7] sm:$0x1] %vm76_vm0, %v160_v42  ;;  %v171_v47 = vadd.f32 %v2849_v44, %v167_v43  ;;  %v178_v48 = vadd.f32 %v2852_v41, %v176_v45  ;;  %v2853_v49 = vld [vmem:[%s2795_s0 + $0x60] sm:$0x1]  ;;  %s186_s28 = scalar_lea.vmem %s4146_s2, %s3542_s30  ;;  %s3590_s16 = sld [smem:[#allocation3 + $0xd]]  ;;  %3043 = vmatpush3.msra.mxu0 %v331_v32  ;;  %v3685_v38 = vshrl.u32 %v281_v37, 7 }
  0x37   :  { %v187_v50 = vld [vmem:[%s186_s28] sm:$0x1]  ;;  %s2798_s19 = scalar_lea.vmem %s4146_s2, %s3551_s25  ;;  %s3599_s7 = sld [smem:[#allocation3 + $0x8d]] }
  0x38   :  { %172 = vst.msk [vmem:[#allocation2 + $0x8] sm:$0x1] %vm76_vm0, %v171_v47  ;;  %v182_v52 = vadd.f32 %v2853_v49, %v178_v48  ;;  %v189_v53 = vadd.f32 %v2856_v46, %v187_v50  ;;  %v2857_v54 = vld [vmem:[%s2798_s19 + $0x60] sm:$0x1]  ;;  %s197_s22 = scalar_lea.vmem %s4146_s2, %s3558_s14  ;;  %s3606_s0 = sld [smem:[#allocation3 + $0xe]]  ;;  %v3688_v39 = vsub.s32 0, %v3685_v38 }
  0x39   :  { %v198_v55 = vld [vmem:[%s197_s22] sm:$0x1]  ;;  %s2801_s27 = scalar_lea.vmem %s4146_s2, %s3567_s20  ;;  %s3615_s28 = sld [smem:[#allocation3 + $0x8e]]  ;;  %v3694_v41 = vsub.s32 1, %v3685_v38 }
  0x3a   :  { %183 = vst.msk [vmem:[#allocation2 + $0x9] sm:$0x1] %vm76_vm0, %v182_v52  ;;  %v193_v57 = vadd.f32 %v2857_v54, %v189_v53  ;;  %v200_v58 = vadd.f32 %v2860_v51, %v198_v55  ;;  %v2861_v59 = vld [vmem:[%s2801_s27 + $0x60] sm:$0x1]  ;;  %s208_s29 = scalar_lea.vmem %s4146_s2, %s3574_s23  ;;  %s3622_s19 = sld [smem:[#allocation3 + $0xf]]  ;;  %v3358_v55 = vmov 0.0  }
  0x3b   :  { %v209_v60 = vld [vmem:[%s208_s29] sm:$0x1]  ;;  %s2804_s21 = scalar_lea.vmem %s4146_s2, %s3583_s13  ;;  %s3631_s22 = sld [smem:[#allocation3 + $0x8f]]  ;;  %3049 = vmatprep.subr.mxu1 %v3358_v55  ;;  %3051 = vmatprep.mubr.msk.f32.mxu1 %vm3359_vm2, %v3358_v55 }
  0x3c   :  { %194 = vst.msk [vmem:[#allocation2 + $0xa] sm:$0x1] %vm76_vm0, %v193_v57  ;;  %v204_v62 = vadd.f32 %v2861_v59, %v200_v58  ;;  %v211_v63 = vadd.f32 %v2864_v56, %v209_v60  ;;  %v2865_v0 = vld [vmem:[%s2804_s21 + $0x60] sm:$0x1]  ;;  %s219_s24 = scalar_lea.vmem %s4146_s2, %s3590_s16  ;;  %v3708_v56 = vld [vmem:[#allocation6] sm:$0xff] }
  0x3d   :  { %v251_v1 = vld [vmem:[#allocation2] sm:$0xff]  ;;  %s2807_s26 = scalar_lea.vmem %s4146_s2, %s3599_s7  ;;  %v337_v57 = vrot.slane %v3708_v56, %v3688_v39  ;;  %s3361_s7 = smov 96  }
  0x3e   :  { %v220_v2 = vld [vmem:[%s219_s24] sm:$0x1]  ;;  %v254_v4 = vsel %vm253_vm1, %v251_v1, 0.0  ;;  %205 = vst.msk [vmem:[#allocation2 + $0xb] sm:$0x1] %vm76_vm0, %v204_v62  ;;  %v215_v5 = vadd.f32 %v2865_v0, %v211_v63  ;;  %s230_s29 = scalar_lea.vmem %s4146_s2, %s3606_s0 }
  0x3f   :  { %v222_v6 = vadd.f32 %v2868_v61, %v220_v2  ;;  %v2869_v7 = vld [vmem:[%s2807_s26 + $0x60] sm:$0x1]  ;;  %255 = vadd.xlane.f32.xlu0 %v254_v4  ;;  %s2810_s18 = scalar_lea.vmem %s4146_s2, %s3615_s28  ;;  %v3362_v4 = vmov 1966171168  }
  0x40   :  { %v231_v8 = vld [vmem:[%s230_s29] sm:$0x1]  ;;  %216 = vst.msk [vmem:[#allocation2 + $0xc] sm:$0x1] %vm76_vm0, %v215_v5  ;;  %s241_s25 = scalar_lea.vmem %s4146_s2, %s3622_s19  ;;  %s3360_s29 = smov 112   ;;  %v298_v5 = vunpack.c.l.s4 %v3362_v4 }
  0x41   :  { %v226_v10 = vadd.f32 %v2869_v7, %v222_v6  ;;  %v233_v11 = vadd.f32 %v2872_v3, %v231_v8  ;;  %v2873_v12 = vld [vmem:[%s2810_s18 + $0x60] sm:$0x1]  ;;  %s2813_s13 = scalar_lea.vmem %s4146_s2, %s3631_s22  ;;  %s3364_s2 = smov 16  }
  0x42   :  { %v242_v13 = vld [vmem:[%s241_s25] sm:$0x1]  ;;  %v299_v8 = vunpack.c.0.s8 %v298_v5 }
  0x43   :  { %227 = vst.msk [vmem:[#allocation2 + $0xd] sm:$0x1] %vm76_vm0, %v226_v10  ;;  %v237_v14 = vadd.f32 %v2873_v12, %v233_v11  ;;  %v244_v15 = vadd.f32 %v2876_v9, %v242_v13  ;;  %v2877_v16 = vld [vmem:[%s2813_s13 + $0x60] sm:$0x1] }
  0x44   :  { %v330_v33 = vld [vmem:[%s4147_s3] sm:$0xff]  ;;  %v302_v10 = vsub.s32 %v299_v8, %v3685_v38 }
  0x45   :  { %238 = vst.msk [vmem:[#allocation2 + $0xe] sm:$0x1] %vm76_vm0, %v237_v14  ;;  %v248_v17 = vadd.f32 %v2877_v16, %v244_v15  ;;  %3044 = vmatprep.subr.mxu0 %v330_v33  ;;  %v250_v40 = vld [vmem:[%s4152_s8] sm:$0xff] }
  0x46   :  { %3045 = vmatpush3.msra.mxu0 %v330_v33  ;;  %v284_v44 = vrot.slane %v250_v40, %v3688_v39  ;;  %v290_v48 = vrot.slane %v250_v40, %v3694_v41  ;;  %v293_v6 = vld [vmem:[%s4145_s1] sm:$0x3]  ;;  %s3363_s1 = smov 64  }
  0x47   :  { %249 = vst.msk [vmem:[#allocation2 + $0xf] sm:$0x1] %vm76_vm0, %v248_v17  ;;  %3059 = vmatprep.subr.mxu0 %v3358_v55  ;;  %v294_v7 = vsub.f32 1.0, %v293_v6 }
  0x49   :  { %v295_v9 = vmul.f32 -1e+09, %v294_v7 }
  0x4b   :  { %v303_v11 = vrot.slane %v295_v9, %v302_v10 }
  0x4d   :  { %v311_v12 = vrot.slane %v303_v11, %v302_v10  ;;  %v304_v13 = vcombine.high %v303_v11, %v303_v11 }
  0x4e   :  { %v252_v18 = vld [vmem:[#allocation2 + $0x8] sm:$0xff] }
  0x4f   :  { %v257_v19 = vsel %vm253_vm1, %v252_v18, 0.0  ;;  %v3765_v14 = vrot.slane %v311_v12, %v3688_v39  ;;  %v318_v15 = vrot.slane %v304_v13, %v302_v10  ;;  %v1092_v12 = vld [vmem:[%s4148_s4 + $0x18] sm:$0xff]  ;;  %v1091_v13 = vld [vmem:[%s4148_s4 + $0x10] sm:$0xff] }
  0x50   :  { %258 = vadd.xlane.f32.xlu0 %v257_v19 }
  0xc8   :  { %v256_v20 = vpop.xlane.xlu0 %255 }
  0xc9   :  { %v261_v21 = vmul.f32 0.03125, %v256_v20 }
  0xcb   :  { %v263_v22 = vsub.f32 %v251_v1, %v261_v21 }
  0xcd   :  { %v265_v23 = vmul.f32 %v263_v22, %v263_v22 }
  0xcf   :  { %v267_v24 = vsel %vm253_vm1, %v265_v23, 0.0 }
  0xd0   :  { %268 = vadd.xlane.f32.xlu1 %v267_v24 }
  0xd9   :  { %v259_v25 = vpop.xlane.xlu0 %258 }
  0xda   :  { %v262_v26 = vmul.f32 0.03125, %v259_v25 }
  0xdc   :  { %v264_v27 = vsub.f32 %v252_v18, %v262_v26  ;;  %v3769_v18 = vrot.slane %v318_v15, %v3688_v39  ;;  %v1090_v15 = vld [vmem:[%s4148_s4 + $0x8] sm:$0xff] }
  0xde   :  { %v266_v28 = vmul.f32 %v264_v27, %v264_v27 }
  0xe0   :  { %v270_v29 = vsel %vm253_vm1, %v266_v28, 0.0 }
  0xe1   :  { %271 = vadd.xlane.f32.xlu1 %v270_v29 }
 0x159   :  { %v269_v34 = vpop.xlane.xlu1 %268 }
 0x15a   :  { %v273_v35 = vmul.f32 0.03125, %v269_v34 }
 0x15c   :  { %v275_v36 = vadd.f32 1e-12, %v273_v35 }
 0x15e   :  { %3255 = vrsqrt.f32 %v275_v36 }
 0x16a   :  { %v272_v42 = vpop.xlane.xlu1 %271 }
 0x16b   :  { %v274_v43 = vmul.f32 0.03125, %v272_v42  ;;  %v3256_v45 = vpop.eup %3255 }
 0x16c   :  { %v279_v47 = vmul.f32 %v3256_v45, %v263_v22 }
 0x16d   :  { %v276_v46 = vadd.f32 1e-12, %v274_v43 }
 0x16e   :  { %v285_v49 = vmul.f32 %v284_v44, %v279_v47 }
 0x16f   :  { %3257 = vrsqrt.f32 %v276_v46 }
 0x170   :  { %v3698_v50 = vadd.f32 %v290_v48, %v285_v49 }
 0x172   :  { %3046 = vmatprep.mubr.msk.f32.mxu0 %vm253_vm1, %v3698_v50 }
 0x17c   :  { %v3258_v51 = vpop.eup %3257 }
 0x17d   :  { %v280_v52 = vmul.f32 %v3258_v51, %v264_v27 }
 0x17f   :  { %v286_v53 = vmul.f32 %v284_v44, %v280_v52 }
 0x181   :  { %v3702_v54 = vadd.f32 %v290_v48, %v286_v53 }
 0x183   :  { %3047 = vmatmul.mubr.msk.f32.vlgmr.msra.gmra.mxu0 %vm253_vm1, %v3702_v54 }
 0x184   :  { %3061 = vmatprep.mubr.msk.f32.mxu0 %vm3359_vm2, %v3358_v55 }
 0x243   :  { %v3048_v58 = vpop.f32.mrf.mxu0 }
 0x244   :  { %v3716_v59 = vadd.f32 %v3048_v58, %v337_v57 }
 0x245   :  { %v410_v60 = vpop.f32.mrf.mxu0 }
 0x246   :  { %v3718_v61 = vadd.f32 %v410_v60, %v337_v57  ;;  %423 = vrot.lane.b32.xlu1 %v3716_v59, %s3360_s29 }
 0x248   :  { %421 = vrot.lane.b32.xlu0 %v3718_v61, %s3360_s29 }
 0x24a   :  { %425 = vrot.lane.b32.xlu1 %v3718_v61, %s3361_s7 }
 0x24e   :  { %502 = vrot.lane.b32.xlu1 %v3716_v59, %s3361_s7 }
 0x2b8   :  { %v3728_v62 = vpop.permute.xlu1 %423 }
 0x2b9   :  { %654 = vrot.lane.b32.xlu1 %v3728_v62, %s3361_s7 }
 0x2ba   :  { %v3732_v63 = vpop.permute.xlu0 %421 }
 0x2bb   :  { %578 = vrot.lane.b32.xlu0 %v3732_v63, %s3361_s7 }
 0x2bc   :  { %v426_v0 = vpop.permute.xlu1 %425 }
 0x2bd   :  { %3050 = vmatpush3.xpose.msk.msra.mxu1 %vm427_vm3, %v426_v0 }
 0x2be   :  { %3054 = vmatprep.subr.mxu1 %v3358_v55 }
 0x2c0   :  { %3052 = vmatmul.mubr.msk.f32.vlgmr.msra.gmra.mxu1 %vm427_vm3, %v3718_v61  ;;  %v503_v1 = vpop.permute.xlu1 %502 }
 0x2c1   :  { %3055 = vmatpush3.xpose.msk.msra.mxu1 %vm427_vm3, %v503_v1  ;;  %3056 = vmatprep.mubr.msk.f32.mxu1 %vm3359_vm2, %v3358_v55 }
 0x2c2   :  { %3064 = vmatprep.subr.mxu1 %v3358_v55 }
 0x2c4   :  { %3057 = vmatmul.mubr.msk.f32.vlgmr.msra.gmra.mxu1 %vm427_vm3, %v3716_v59 }
 0x2c5   :  { %3066 = vmatprep.mubr.msk.f32.mxu1 %vm3359_vm2, %v3358_v55 }
 0x32b   :  { %v655_v2 = vpop.permute.xlu1 %654 }
 0x32c   :  { %3065 = vmatpush3.xpose.msk.msra.mxu1 %vm427_vm3, %v655_v2 }
 0x32d   :  { %v579_v3 = vpop.permute.xlu0 %578  ;;  %3074 = vmatprep.subr.mxu1 %v3358_v55 }
 0x32e   :  { %3060 = vmatpush3.xpose.msk.msra.mxu0 %vm427_vm3, %v579_v3 }
 0x32f   :  { %3067 = vmatmul.mubr.msk.f32.vlgmr.msra.gmra.mxu1 %vm427_vm3, %v3728_v62  ;;  %3069 = vmatprep.subr.mxu0 %v3358_v55 }
 0x330   :  { %3076 = vmatprep.mubr.msk.f32.mxu1 %vm3359_vm2, %v3358_v55 }
 0x331   :  { %3062 = vmatmul.mubr.msk.f32.vlgmr.msra.gmra.mxu0 %vm427_vm3, %v3732_v63 }
 0x332   :  { %3071 = vmatprep.mubr.msk.f32.mxu0 %vm3359_vm2, %v3358_v55 }
 0x380   :  { %v498_v16 = vpop.f32.mrf.mxu1 }
 0x381   :  { %v499_v17 = vadd.f32 %v498_v16, %v3765_v14 }
 0x382   :  { %v3053_v19 = vpop.f32.mrf.mxu1 }
 0x383   :  { %v731_v20 = vsel %vm730_vm4, %v499_v17, -inf }
 0x384   :  { %v574_v21 = vpop.f32.mrf.mxu1  ;;  %732 = vmax.xlane.f32.xlu0 %v731_v20 }
 0x385   :  { %v575_v22 = vadd.f32 %v574_v21, %v3769_v18 }
 0x386   :  { %v3058_v23 = vpop.f32.mrf.mxu1 }
 0x387   :  { %v734_v24 = vsel %vm730_vm4, %v575_v22, -inf }
 0x388   :  { %735 = vmax.xlane.f32.xlu1 %v734_v24 }
 0x3ef   :  { %v726_v25 = vpop.f32.mrf.mxu1 }
 0x3f0   :  { %v727_v30 = vadd.f32 %v726_v25, %v3769_v18 }
 0x3f1   :  { %v650_v26 = vpop.f32.mrf.mxu0  ;;  %v3068_v27 = vpop.f32.mrf.mxu1 }
 0x3f2   :  { %v651_v28 = vadd.f32 %v650_v26, %v3765_v14  ;;  %v740_v32 = vsel %vm730_vm4, %v727_v30, -inf }
 0x3f3   :  { %v3063_v29 = vpop.f32.mrf.mxu0 }
 0x3f4   :  { %v737_v31 = vsel %vm730_vm4, %v651_v28, -inf }
 0x3f5   :  { %738 = vmax.xlane.f32.xlu0 %v737_v31 }
 0x3f9   :  { %741 = vmax.xlane.f32.xlu0 %v740_v32 }
 0x40d   :  { %v733_v33 = vpop.xlane.xlu0 %732 }
 0x40e   :  { %v743_v34 = vsub.f32 %v499_v17, %v733_v33  ;;  %v1089_v17 = vld [vmem:[%s4148_s4] sm:$0xff] }
 0x410   :  { %v747_v35 = vmul.f32 1.442695, %v743_v34 }
 0x411   :  { %v736_v36 = vpop.xlane.xlu1 %735 }
 0x412   :  { %3259 = vpow2.f32 %v747_v35  ;;  %v744_v37 = vsub.f32 %v575_v22, %v736_v36 }
 0x414   :  { %v749_v40 = vmul.f32 1.442695, %v744_v37 }
 0x416   :  { %3261 = vpow2.f32 %v749_v40 }
 0x41f   :  { %v3260_v42 = vpop.eup %3259 }
 0x420   :  { %v755_v43 = vsel %vm730_vm4, %v3260_v42, 0.0 }
 0x421   :  { %756 = vadd.xlane.f32.xlu0 %v755_v43 }
 0x423   :  { %v3262_v44 = vpop.eup %3261 }
 0x424   :  { %v758_v45 = vsel %vm730_vm4, %v3262_v44, 0.0 }
 0x425   :  { %759 = vadd.xlane.f32.xlu1 %v758_v45 }
 0x47e   :  { %v739_v46 = vpop.xlane.xlu0 %738 }
 0x47f   :  { %v745_v47 = vsub.f32 %v651_v28, %v739_v46 }
 0x481   :  { %v751_v48 = vmul.f32 1.442695, %v745_v47 }
 0x482   :  { %v742_v49 = vpop.xlane.xlu0 %741 }
 0x483   :  { %3263 = vpow2.f32 %v751_v48  ;;  %v746_v51 = vsub.f32 %v727_v30, %v742_v49  ;;  %v1096_v30 = vrot.slane %v3708_v56, %v3694_v41 }
 0x485   :  { %v753_v52 = vmul.f32 1.442695, %v746_v51 }
 0x487   :  { %3265 = vpow2.f32 %v753_v52  ;;  %v1220_v52 = vld [vmem:[%s4149_s5 + $0x10] sm:$0xff] }
 0x490   :  { %v3264_v53 = vpop.eup %3263 }
 0x491   :  { %v761_v57 = vsel %vm730_vm4, %v3264_v53, 0.0 }
 0x492   :  { %762 = vadd.xlane.f32.xlu0 %v761_v57  ;;  %v1218_v57 = vld [vmem:[%s4149_s5] sm:$0xff] }
 0x494   :  { %v3266_v58 = vpop.eup %3265 }
 0x495   :  { %v764_v60 = vsel %vm730_vm4, %v3266_v58, 0.0 }
 0x496   :  { %765 = vadd.xlane.f32.xlu1 %v764_v60 }
 0x4a7   :  { %851 = vrot.lane.b32.xlu1 %v3716_v59, %s3363_s1 }
 0x4a8   :  { %775 = vrot.lane.b32.xlu0 %v3718_v61, %s3363_s1 }
 0x4aa   :  { %v757_v0 = vpop.xlane.xlu0 %756 }
 0x4ab   :  { %927 = vrot.lane.b32.xlu1 %v3732_v63, %s3363_s1  ;;  %3267 = vrcp.f32 %v757_v0 }
 0x4ae   :  { %v760_v1 = vpop.xlane.xlu1 %759 }
 0x4af   :  { %1003 = vrot.lane.b32.xlu1 %v3728_v62, %s3363_s1  ;;  %3269 = vrcp.f32 %v760_v1 }
 0x4b8   :  { %v3268_v3 = vpop.eup %3267 }
 0x4b9   :  { %v771_v6 = vmul.f32 %v3268_v3, %v3260_v42 }
 0x4bc   :  { %v3270_v59 = vpop.eup %3269 }
 0x4bd   :  { %v772_v62 = vmul.f32 %v3270_v59, %v3262_v44 }
 0x51b   :  { %v763_v2 = vpop.xlane.xlu0 %762 }
 0x51c   :  { %3271 = vrcp.f32 %v763_v2 }
 0x51f   :  { %v766_v4 = vpop.xlane.xlu1 %765  ;;  %v776_v5 = vpop.permute.xlu0 %775 }
 0x520   :  { %3273 = vrcp.f32 %v766_v4  ;;  %3070 = vmatpush3.msra.mxu0 %v776_v5  ;;  %v3839_v4 = vsub.s32 2, %v3685_v38  ;;  %v3842_v5 = vsub.s32 3, %v3685_v38 }
 0x521   :  { %3072 = vmatmul.mubr.msk.f32.vlgmr.msra.gmra.mxu0 %vm730_vm4, %v771_v6  ;;  %3079 = vmatprep.subr.mxu0 %v3358_v55 }
 0x522   :  { %3081 = vmatprep.mubr.msk.f32.mxu0 %vm3359_vm2, %v3358_v55  ;;  %v1209_v6 = vrot.slane %v3708_v56, %v3839_v4 }
 0x523   :  { %v852_v61 = vpop.permute.xlu1 %851 }
 0x524   :  { %3075 = vmatpush3.msra.mxu1 %v852_v61 }
 0x525   :  { %3077 = vmatmul.mubr.msk.f32.vlgmr.msra.gmra.mxu1 %vm730_vm4, %v772_v62  ;;  %3084 = vmatprep.subr.mxu1 %v3358_v55  ;;  %v1215_v62 = vrot.slane %v3708_v56, %v3842_v5 }
 0x526   :  { %3086 = vmatprep.mubr.msk.f32.mxu1 %vm3359_vm2, %v3358_v55 }
 0x527   :  { %v928_v63 = vpop.permute.xlu1 %927 }
 0x528   :  { %3080 = vmatpush3.msra.mxu0 %v928_v63 }
 0x529   :  { %v3272_v7 = vpop.eup %3271  ;;  %3089 = vmatprep.subr.mxu0 %v1092_v12 }
 0x52a   :  { %v773_v8 = vmul.f32 %v3272_v7, %v3264_v53  ;;  %v1219_v53 = vld [vmem:[%s4149_s5 + $0x8] sm:$0xff] }
 0x52b   :  { %v1004_v9 = vpop.permute.xlu1 %1003 }
 0x52c   :  { %3082 = vmatmul.mubr.msk.f32.vlgmr.msra.gmra.mxu0 %vm730_vm4, %v773_v8  ;;  %3085 = vmatpush3.msra.mxu1 %v1004_v9 }
 0x52d   :  { %v3274_v10 = vpop.eup %3273  ;;  %3090 = vmatpush3.msra.mxu0 %v1092_v12  ;;  %v1332_v12 = vld [vmem:[%s4150_s6 + $0x38] sm:$0xff] }
 0x52e   :  { %v774_v11 = vmul.f32 %v3274_v10, %v3266_v58  ;;  %3091 = vmatprep.subr.mxu0 %v1091_v13 }
 0x52f   :  { %3092 = vmatpush3.msra.mxu0 %v1091_v13  ;;  %v1331_v13 = vld [vmem:[%s4150_s6 + $0x30] sm:$0xff] }
 0x530   :  { %3087 = vmatmul.mubr.msk.f32.vlgmr.msra.gmra.mxu1 %vm730_vm4, %v774_v11  ;;  %3093 = vmatprep.subr.mxu0 %v1090_v15 }
 0x531   :  { %3094 = vmatpush3.msra.mxu0 %v1090_v15  ;;  %v1330_v15 = vld [vmem:[%s4150_s6 + $0x28] sm:$0xff] }
 0x532   :  { %3095 = vmatprep.subr.mxu0 %v1089_v17 }
 0x533   :  { %3096 = vmatpush3.msra.mxu0 %v1089_v17  ;;  %v1328_v17 = vld [vmem:[%s4150_s6 + $0x18] sm:$0xff] }
 0x534   :  { %3111 = vmatprep.subr.mxu0 %v1332_v12 }
 0x5e1   :  { %v847_v16 = vpop.f32.mrf.mxu0 }
 0x5e3   :  { %v3073_v19 = vpop.f32.mrf.mxu0 }
 0x5e4   :  { %v1327_v19 = vld [vmem:[%s4150_s6 + $0x10] sm:$0xff] }
 0x5e5   :  { %v923_v20 = vpop.f32.mrf.mxu1 }
 0x5e7   :  { %v3078_v21 = vpop.f32.mrf.mxu1 }
 0x5e8   :  { %v1325_v21 = vld [vmem:[%s4150_s6] sm:$0xff] }
 0x5ec   :  { %v999_v22 = vpop.f32.mrf.mxu0 }
 0x5ed   :  { %1081 = vrot.lane.b32.xlu0 %v999_v22, %s3364_s2  ;;  %v1224_v22 = vsub.s32 4, %v3685_v38 }
 0x5ee   :  { %v3083_v23 = vpop.f32.mrf.mxu0 }
 0x5ef   :  { %v1225_v23 = vrot.slane %v3708_v56, %v1224_v22 }
 0x5f0   :  { %v1075_v24 = vpop.f32.mrf.mxu1 }
 0x5f1   :  { %1083 = vrot.lane.b32.xlu1 %v1075_v24, %s3364_s2 }
 0x5f2   :  { %v3088_v25 = vpop.f32.mrf.mxu1 }
 0x65f   :  { %v1082_v26 = vpop.permute.xlu0 %1081 }
 0x660   :  { %v1087_v27 = vsel %vm427_vm3, %v847_v16, %v1082_v26  ;;  %v1329_v16 = vld [vmem:[%s4150_s6 + $0x20] sm:$0xff] }
 0x661   :  { %3097 = vmatprep.mubr.msk.f32.mxu0 %vm253_vm1, %v1087_v27 }
 0x663   :  { %v1084_v28 = vpop.permute.xlu1 %1083 }
 0x664   :  { %v1088_v29 = vsel %vm427_vm3, %v923_v20, %v1084_v28  ;;  %v1326_v20 = vld [vmem:[%s4150_s6 + $0x8] sm:$0xff] }
 0x665   :  { %3098 = vmatmul.mubr.msk.f32.vlgmr.msra.gmra.mxu0 %vm253_vm1, %v1088_v29 }
 0x666   :  { %3112 = vmatpush3.msra.mxu0 %v1332_v12  ;;  %v2898_v12 = vld [vmem:[%s4147_s3 + $0x20] sm:$0xff] }
 0x667   :  { %3113 = vmatprep.subr.mxu0 %v1331_v13 }
 0x668   :  { %3114 = vmatpush3.msra.mxu0 %v1331_v13 }
 0x669   :  { %3115 = vmatprep.subr.mxu0 %v1330_v15 }
 0x66a   :  { %3116 = vmatpush3.msra.mxu0 %v1330_v15 }
 0x66b   :  { %3117 = vmatprep.subr.mxu0 %v1329_v16 }
 0x66c   :  { %3118 = vmatpush3.msra.mxu0 %v1329_v16 }
 0x66d   :  { %3119 = vmatprep.subr.mxu0 %v1328_v17 }
 0x66e   :  { %3120 = vmatpush3.msra.mxu0 %v1328_v17 }
 0x66f   :  { %3121 = vmatprep.subr.mxu0 %v1327_v19 }
 0x670   :  { %3122 = vmatpush3.msra.mxu0 %v1327_v19 }
 0x671   :  { %3123 = vmatprep.subr.mxu0 %v1326_v20 }
 0x672   :  { %3124 = vmatpush3.msra.mxu0 %v1326_v20 }
 0x673   :  { %3125 = vmatprep.subr.mxu0 %v1325_v21 }
 0x674   :  { %3126 = vmatpush3.msra.mxu0 %v1325_v21  ;;  %v1449_v21 = vsub.s32 6, %v3685_v38 }
 0x675   :  { %3151 = vmatprep.subr.mxu0 %v3358_v55 }
 0x725   :  { %v3099_v31 = vpop.f32.mrf.mxu0 }
 0x726   :  { %v1175_v32 = vadd.f32 %v3099_v31, %v1096_v30 }
 0x727   :  { %v1169_v33 = vpop.f32.mrf.mxu0 }
 0x728   :  { %v1170_v34 = vadd.f32 %v1169_v33, %v1096_v30  ;;  %v1179_v35 = vadd.f32 %v1175_v32, %v3702_v54 }
 0x72a   :  { %v1183_v36 = vsel %vm253_vm1, %v1179_v35, 0.0  ;;  %v1178_v37 = vadd.f32 %v1170_v34, %v3698_v50  ;;  %v1221_v50 = vld [vmem:[%s4149_s5 + $0x18] sm:$0xff] }
 0x72b   :  { %1184 = vadd.xlane.f32.xlu1 %v1183_v36  ;;  %3100 = vmatprep.subr.mxu1 %v1221_v50 }
 0x72c   :  { %v1180_v40 = vsel %vm253_vm1, %v1178_v37, 0.0  ;;  %3101 = vmatpush3.msra.mxu1 %v1221_v50 }
 0x72d   :  { %1181 = vadd.xlane.f32.xlu0 %v1180_v40  ;;  %3102 = vmatprep.subr.mxu1 %v1220_v52 }
 0x72e   :  { %3103 = vmatpush3.msra.mxu1 %v1220_v52 }
 0x72f   :  { %3104 = vmatprep.subr.mxu1 %v1219_v53 }
 0x730   :  { %3105 = vmatpush3.msra.mxu1 %v1219_v53 }
 0x731   :  { %3106 = vmatprep.subr.mxu1 %v1218_v57 }
 0x732   :  { %3107 = vmatpush3.msra.mxu1 %v1218_v57 }
 0x7b4   :  { %v1185_v42 = vpop.xlane.xlu1 %1184 }
 0x7b5   :  { %v1187_v43 = vmul.f32 0.03125, %v1185_v42 }
 0x7b6   :  { %v1182_v44 = vpop.xlane.xlu0 %1181 }
 0x7b7   :  { %v1186_v45 = vmul.f32 0.03125, %v1182_v44  ;;  %v1189_v46 = vsub.f32 %v1179_v35, %v1187_v43 }
 0x7b9   :  { %v1188_v47 = vsub.f32 %v1178_v37, %v1186_v45  ;;  %v1191_v51 = vmul.f32 %v1189_v46, %v1189_v46 }
 0x7bb   :  { %v1190_v48 = vmul.f32 %v1188_v47, %v1188_v47  ;;  %v1195_v54 = vsel %vm253_vm1, %v1191_v51, 0.0 }
 0x7bd   :  { %v1192_v49 = vsel %vm253_vm1, %v1190_v48, 0.0 }
 0x7be   :  { %1193 = vadd.xlane.f32.xlu0 %v1192_v49  ;;  %v1335_v49 = vsub.s32 5, %v3685_v38 }
 0x7c0   :  { %v1336_v51 = vrot.slane %v3708_v56, %v1335_v49 }
 0x7c2   :  { %1196 = vadd.xlane.f32.xlu0 %v1195_v54 }
 0x847   :  { %v1194_v58 = vpop.xlane.xlu0 %1193 }
 0x848   :  { %v1198_v60 = vmul.f32 0.03125, %v1194_v58 }
 0x84a   :  { %v1200_v0 = vadd.f32 1e-12, %v1198_v60 }
 0x84b   :  { %v1197_v1 = vpop.xlane.xlu0 %1196 }
 0x84c   :  { %3275 = vrsqrt.f32 %v1200_v0  ;;  %v1199_v2 = vmul.f32 0.03125, %v1197_v1 }
 0x84e   :  { %v1201_v3 = vadd.f32 1e-12, %v1199_v2 }
 0x850   :  { %3277 = vrsqrt.f32 %v1201_v3 }
 0x859   :  { %v3276_v59 = vpop.eup %3275 }
 0x85a   :  { %v1204_v61 = vmul.f32 %v3276_v59, %v1188_v47 }
 0x85c   :  { %v1210_v63 = vmul.f32 %v1209_v6, %v1204_v61 }
 0x85d   :  { %v3278_v7 = vpop.eup %3277 }
 0x85e   :  { %v1205_v8 = vmul.f32 %v3278_v7, %v1189_v46  ;;  %v3848_v9 = vadd.f32 %v1215_v62, %v1210_v63 }
 0x860   :  { %v1211_v10 = vmul.f32 %v1209_v6, %v1205_v8  ;;  %3108 = vmatprep.mubr.msk.f32.mxu1 %vm253_vm1, %v3848_v9 }
 0x862   :  { %v3852_v11 = vadd.f32 %v1215_v62, %v1211_v10  ;;  %v2900_v10 = vld [vmem:[%s4147_s3 + $0x30] sm:$0xff] }
 0x864   :  { %3109 = vmatmul.mubr.msk.f32.vlgmr.msra.gmra.mxu1 %vm253_vm1, %v3852_v11 }
 0x924   :  { %v3110_v24 = vpop.f32.mrf.mxu1 }
 0x925   :  { %v1304_v25 = vadd.f32 %v3110_v24, %v1225_v23  ;;  %v1450_v24 = vrot.slane %v3708_v56, %v1449_v21 }
 0x926   :  { %v1298_v26 = vpop.f32.mrf.mxu1 }
 0x927   :  { %v1308_v27 = vmul.f32 %v1304_v25, %v1304_v25  ;;  %v1299_v28 = vadd.f32 %v1298_v26, %v1225_v23 }
 0x929   :  { %v1310_v29 = vmul.f32 %v1308_v27, %v1304_v25  ;;  %v1307_v30 = vmul.f32 %v1299_v28, %v1299_v28 }
 0x92b   :  { %v1312_v31 = vmul.f32 0.044715, %v1310_v29  ;;  %v1309_v32 = vmul.f32 %v1307_v30, %v1299_v28 }
 0x92d   :  { %v1314_v33 = vadd.f32 %v1312_v31, %v1304_v25  ;;  %v1311_v34 = vmul.f32 0.044715, %v1309_v32 }
 0x92f   :  { %v1316_v35 = vmul.f32 0.7978846, %v1314_v33  ;;  %v1313_v36 = vadd.f32 %v1311_v34, %v1299_v28  ;;  %v3930_v34 = vld [vmem:[#allocation6 + $0x8] sm:$0xff] }
 0x931   :  { %3279 = vtanh.f32 %v1316_v35  ;;  %v1315_v37 = vmul.f32 0.7978846, %v1313_v36  ;;  %v1469_v35 = vrot.slane %v3930_v34, %v3688_v39 }
 0x933   :  { %3281 = vtanh.f32 %v1315_v37 }
 0x93e   :  { %v3280_v40 = vpop.eup %3279 }
 0x93f   :  { %v1320_v42 = vadd.f32 1.0, %v3280_v40 }
 0x940   :  { %v3282_v43 = vpop.eup %3281 }
 0x941   :  { %v1319_v44 = vadd.f32 1.0, %v3282_v43  ;;  %v1322_v45 = vmul.f32 0.5, %v1320_v42 }
 0x943   :  { %v1321_v46 = vmul.f32 0.5, %v1319_v44  ;;  %v1324_v48 = vmul.f32 %v1322_v45, %v1304_v25  ;;  %v1455_v25 = vsub.s32 7, %v3685_v38  ;;  %v2680_v38 = vld [vmem:[%s4154_s10 + $0x18] sm:$0xff] }
 0x945   :  { %v1323_v47 = vmul.f32 %v1321_v46, %v1299_v28  ;;  %v1456_v30 = vrot.slane %v3708_v56, %v1455_v25 }
 0x947   :  { %3127 = vmatprep.mubr.msk.f32.mxu0 %vm1337_vm5, %v1323_v47 }
 0x948   :  { %3128 = vmatmul.mubr.msk.f32.vlgmr.msra.gmra.mxu0 %vm1337_vm5, %v1324_v48 }
 0x949   :  { %3153 = vmatprep.mubr.msk.f32.mxu0 %vm3359_vm2, %v3358_v55 }
 0xa08   :  { %v3129_v54 = vpop.f32.mrf.mxu0 }
 0xa09   :  { %v1416_v50 = vadd.f32 %v3129_v54, %v1336_v51 }
 0xa0a   :  { %v1410_v52 = vpop.f32.mrf.mxu0 }
 0xa0b   :  { %v1411_v53 = vadd.f32 %v1410_v52, %v1336_v51  ;;  %v1420_v57 = vadd.f32 %v1416_v50, %v3852_v11  ;;  %v2899_v11 = vld [vmem:[%s4147_s3 + $0x28] sm:$0xff] }
 0xa0d   :  { %v1424_v58 = vsel %vm253_vm1, %v1420_v57, 0.0  ;;  %v1419_v60 = vadd.f32 %v1411_v53, %v3848_v9  ;;  %v2901_v9 = vld [vmem:[%s4147_s3 + $0x38] sm:$0xff] }
 0xa0e   :  { %1425 = vadd.xlane.f32.xlu1 %v1424_v58  ;;  %3130 = vmatprep.subr.mxu1 %v2901_v9 }
 0xa0f   :  { %v1421_v0 = vsel %vm253_vm1, %v1419_v60, 0.0  ;;  %3131 = vmatpush3.msra.mxu1 %v2901_v9 }
 0xa10   :  { %1422 = vadd.xlane.f32.xlu0 %v1421_v0  ;;  %3132 = vmatprep.subr.mxu1 %v2900_v10 }
 0xa11   :  { %3133 = vmatpush3.msra.mxu1 %v2900_v10 }
 0xa12   :  { %3134 = vmatprep.subr.mxu1 %v2899_v11 }
 0xa13   :  { %3135 = vmatpush3.msra.mxu1 %v2899_v11 }
 0xa14   :  { %3136 = vmatprep.subr.mxu1 %v2898_v12 }
 0xa15   :  { %3137 = vmatpush3.msra.mxu1 %v2898_v12 }
 0xa16   :  { %3141 = vmatprep.subr.mxu1 %v3358_v55 }
 0xa97   :  { %v1426_v1 = vpop.xlane.xlu1 %1425 }
 0xa98   :  { %v1428_v2 = vmul.f32 0.03125, %v1426_v1 }
 0xa99   :  { %v1423_v3 = vpop.xlane.xlu0 %1422 }
 0xa9a   :  { %v1430_v6 = vsub.f32 %v1420_v57, %v1428_v2  ;;  %v1427_v59 = vmul.f32 0.03125, %v1423_v3 }
 0xa9c   :  { %v1429_v61 = vsub.f32 %v1419_v60, %v1427_v59  ;;  %v1432_v62 = vmul.f32 %v1430_v6, %v1430_v6 }
 0xa9e   :  { %v1436_v63 = vsel %vm253_vm1, %v1432_v62, 0.0  ;;  %v1431_v7 = vmul.f32 %v1429_v61, %v1429_v61 }
 0xa9f   :  { %1437 = vadd.xlane.f32.xlu1 %v1436_v63 }
 0xaa0   :  { %v1433_v8 = vsel %vm253_vm1, %v1431_v7, 0.0 }
 0xaa1   :  { %1434 = vadd.xlane.f32.xlu0 %v1433_v8 }
 0xb28   :  { %v1438_v13 = vpop.xlane.xlu1 %1437 }
 0xb29   :  { %v1440_v15 = vmul.f32 0.03125, %v1438_v13 }
 0xb2a   :  { %v1435_v16 = vpop.xlane.xlu0 %1434 }
 0xb2b   :  { %v1442_v17 = vadd.f32 1e-12, %v1440_v15  ;;  %v1439_v19 = vmul.f32 0.03125, %v1435_v16 }
 0xb2d   :  { %3283 = vrsqrt.f32 %v1442_v17  ;;  %v1441_v20 = vadd.f32 1e-12, %v1439_v19 }
 0xb2f   :  { %3285 = vrsqrt.f32 %v1441_v20 }
 0xb3a   :  { %v3284_v23 = vpop.eup %3283 }
 0xb3b   :  { %v1446_v26 = vmul.f32 %v3284_v23, %v1430_v6 }
 0xb3c   :  { %v3286_v27 = vpop.eup %3285 }
 0xb3d   :  { %v1445_v28 = vmul.f32 %v3286_v27, %v1429_v61  ;;  %v1452_v29 = vmul.f32 %v1450_v24, %v1446_v26 }
 0xb3f   :  { %v1451_v31 = vmul.f32 %v1450_v24, %v1445_v28  ;;  %v3922_v33 = vadd.f32 %v1456_v30, %v1452_v29 }
 0xb41   :  { %v3920_v32 = vadd.f32 %v1456_v30, %v1451_v31 }
 0xb43   :  { %3138 = vmatprep.mubr.msk.f32.mxu1 %vm253_vm1, %v3920_v32 }
 0xb44   :  { %3139 = vmatmul.mubr.msk.f32.vlgmr.msra.gmra.mxu1 %vm253_vm1, %v3922_v33 }
 0xb45   :  { %3143 = vmatprep.mubr.msk.f32.mxu1 %vm3359_vm2, %v3358_v55 }
 0xc04   :  { %v3140_v56 = vpop.f32.mrf.mxu1 }
 0xc05   :  { %v3934_v36 = vadd.f32 %v3140_v56, %v1469_v35 }
 0xc06   :  { %v1542_v37 = vpop.f32.mrf.mxu1 }
 0xc07   :  { %v3936_v40 = vadd.f32 %v1542_v37, %v1469_v35  ;;  %1555 = vrot.lane.b32.xlu1 %v3934_v36, %s3360_s29 }
 0xc09   :  { %1553 = vrot.lane.b32.xlu0 %v3936_v40, %s3360_s29 }
 0xc0b   :  { %1557 = vrot.lane.b32.xlu1 %v3936_v40, %s3361_s7 }
 0xc0f   :  { %1633 = vrot.lane.b32.xlu1 %v3934_v36, %s3361_s7 }
 0xc79   :  { %v3946_v42 = vpop.permute.xlu1 %1555 }
 0xc7a   :  { %1785 = vrot.lane.b32.xlu1 %v3946_v42, %s3361_s7 }
 0xc7b   :  { %v3950_v39 = vpop.permute.xlu0 %1553 }
 0xc7c   :  { %1709 = vrot.lane.b32.xlu0 %v3950_v39, %s3361_s7 }
 0xc7d   :  { %v1558_v43 = vpop.permute.xlu1 %1557 }
 0xc7e   :  { %3142 = vmatpush3.xpose.msk.msra.mxu1 %vm427_vm3, %v1558_v43 }
 0xc7f   :  { %3146 = vmatprep.subr.mxu1 %v3358_v55 }
 0xc81   :  { %3144 = vmatmul.mubr.msk.f32.vlgmr.msra.gmra.mxu1 %vm427_vm3, %v3936_v40  ;;  %v1634_v44 = vpop.permute.xlu1 %1633 }
 0xc82   :  { %3147 = vmatpush3.xpose.msk.msra.mxu1 %vm427_vm3, %v1634_v44  ;;  %3148 = vmatprep.mubr.msk.f32.mxu1 %vm3359_vm2, %v3358_v55 }
 0xc83   :  { %3156 = vmatprep.subr.mxu1 %v3358_v55 }
 0xc85   :  { %3149 = vmatmul.mubr.msk.f32.vlgmr.msra.gmra.mxu1 %vm427_vm3, %v3934_v36 }
 0xc86   :  { %3158 = vmatprep.mubr.msk.f32.mxu1 %vm3359_vm2, %v3358_v55 }
 0xcec   :  { %v1786_v45 = vpop.permute.xlu1 %1785 }
 0xced   :  { %3157 = vmatpush3.xpose.msk.msra.mxu1 %vm427_vm3, %v1786_v45 }
 0xcee   :  { %v1710_v46 = vpop.permute.xlu0 %1709  ;;  %3166 = vmatprep.subr.mxu1 %v3358_v55 }
 0xcef   :  { %3152 = vmatpush3.xpose.msk.msra.mxu0 %vm427_vm3, %v1710_v46 }
 0xcf0   :  { %3159 = vmatmul.mubr.msk.f32.vlgmr.msra.gmra.mxu1 %vm427_vm3, %v3946_v42  ;;  %3161 = vmatprep.subr.mxu0 %v3358_v55 }
 0xcf1   :  { %3168 = vmatprep.mubr.msk.f32.mxu1 %vm3359_vm2, %v3358_v55 }
 0xcf2   :  { %3154 = vmatmul.mubr.msk.f32.vlgmr.msra.gmra.mxu0 %vm427_vm3, %v3950_v39 }
 0xcf3   :  { %3163 = vmatprep.mubr.msk.f32.mxu0 %vm3359_vm2, %v3358_v55 }
 0xd41   :  { %v1629_v47 = vpop.f32.mrf.mxu1 }
 0xd42   :  { %v1630_v48 = vadd.f32 %v1629_v47, %v3765_v14  ;;  %v2919_v47 = vld [vmem:[%s4148_s4 + $0x38] sm:$0xff] }
 0xd43   :  { %v3145_v51 = vpop.f32.mrf.mxu1 }
 0xd44   :  { %v1861_v54 = vsel %vm730_vm4, %v1630_v48, -inf  ;;  %v2917_v51 = vld [vmem:[%s4148_s4 + $0x28] sm:$0xff] }
 0xd45   :  { %v1705_v50 = vpop.f32.mrf.mxu1  ;;  %1862 = vmax.xlane.f32.xlu0 %v1861_v54 }
 0xd46   :  { %v1706_v52 = vadd.f32 %v1705_v50, %v3769_v18  ;;  %v2916_v50 = vld [vmem:[%s4148_s4 + $0x20] sm:$0xff] }
 0xd47   :  { %v3150_v53 = vpop.f32.mrf.mxu1 }
 0xd48   :  { %v1864_v57 = vsel %vm730_vm4, %v1706_v52, -inf }
 0xd49   :  { %1865 = vmax.xlane.f32.xlu1 %v1864_v57 }
 0xdb0   :  { %v1857_v58 = vpop.f32.mrf.mxu1 }
 0xdb1   :  { %v1858_v3 = vadd.f32 %v1857_v58, %v3769_v18 }
 0xdb2   :  { %v1781_v60 = vpop.f32.mrf.mxu0  ;;  %v3160_v0 = vpop.f32.mrf.mxu1 }
 0xdb3   :  { %v1782_v1 = vadd.f32 %v1781_v60, %v3765_v14  ;;  %v1870_v59 = vsel %vm730_vm4, %v1858_v3, -inf }
 0xdb4   :  { %v3155_v2 = vpop.f32.mrf.mxu0 }
 0xdb5   :  { %v1867_v6 = vsel %vm730_vm4, %v1782_v1, -inf }
 0xdb6   :  { %1868 = vmax.xlane.f32.xlu0 %v1867_v6 }
 0xdba   :  { %1871 = vmax.xlane.f32.xlu0 %v1870_v59 }
 0xdce   :  { %v1863_v61 = vpop.xlane.xlu0 %1862 }
 0xdcf   :  { %v1873_v62 = vsub.f32 %v1630_v48, %v1863_v61  ;;  %v2918_v48 = vld [vmem:[%s4148_s4 + $0x30] sm:$0xff]  ;;  %v2227_v61 = vrot.slane %v3930_v34, %v3694_v41 }
 0xdd1   :  { %v1877_v63 = vmul.f32 1.442695, %v1873_v62 }
 0xdd2   :  { %v1866_v7 = vpop.xlane.xlu1 %1865 }
 0xdd3   :  { %3287 = vpow2.f32 %v1877_v63  ;;  %v1874_v8 = vsub.f32 %v1706_v52, %v1866_v7 }
 0xdd5   :  { %v1879_v9 = vmul.f32 1.442695, %v1874_v8 }
 0xdd7   :  { %3289 = vpow2.f32 %v1879_v9 }
 0xde0   :  { %v3288_v10 = vpop.eup %3287 }
 0xde1   :  { %v1885_v14 = vsel %vm730_vm4, %v3288_v10, 0.0 }
 0xde2   :  { %1886 = vadd.xlane.f32.xlu0 %v1885_v14 }
 0xde4   :  { %v3290_v11 = vpop.eup %3289 }
 0xde5   :  { %v1888_v18 = vsel %vm730_vm4, %v3290_v11, 0.0 }
 0xde6   :  { %1889 = vadd.xlane.f32.xlu1 %v1888_v18 }
 0xe3f   :  { %v1869_v12 = vpop.xlane.xlu0 %1868 }
 0xe40   :  { %v1875_v13 = vsub.f32 %v1782_v1, %v1869_v12 }
 0xe42   :  { %v1881_v15 = vmul.f32 1.442695, %v1875_v13 }
 0xe43   :  { %v1872_v16 = vpop.xlane.xlu0 %1871 }
 0xe44   :  { %3291 = vpow2.f32 %v1881_v15  ;;  %v1876_v17 = vsub.f32 %v1858_v3, %v1872_v16 }
 0xe46   :  { %v1883_v19 = vmul.f32 1.442695, %v1876_v17 }
 0xe48   :  { %3293 = vpow2.f32 %v1883_v19 }
 0xe51   :  { %v3292_v20 = vpop.eup %3291 }
 0xe52   :  { %v1891_v23 = vsel %vm730_vm4, %v3292_v20, 0.0 }
 0xe53   :  { %1892 = vadd.xlane.f32.xlu0 %v1891_v23  ;;  %v2924_v23 = vld [vmem:[%s4149_s5 + $0x30] sm:$0xff] }
 0xe55   :  { %v3294_v24 = vpop.eup %3293 }
 0xe56   :  { %v1894_v26 = vsel %vm730_vm4, %v3294_v24, 0.0 }
 0xe57   :  { %1895 = vadd.xlane.f32.xlu1 %v1894_v26  ;;  %v2922_v26 = vld [vmem:[%s4149_s5 + $0x20] sm:$0xff] }
 0xe68   :  { %1981 = vrot.lane.b32.xlu1 %v3934_v36, %s3363_s1 }
 0xe69   :  { %1905 = vrot.lane.b32.xlu0 %v3936_v40, %s3363_s1 }
 0xe6b   :  { %v1887_v27 = vpop.xlane.xlu0 %1886 }
 0xe6c   :  { %2057 = vrot.lane.b32.xlu1 %v3950_v39, %s3363_s1  ;;  %3295 = vrcp.f32 %v1887_v27 }
 0xe6f   :  { %v1890_v28 = vpop.xlane.xlu1 %1889 }
 0xe70   :  { %2133 = vrot.lane.b32.xlu1 %v3946_v42, %s3363_s1  ;;  %3297 = vrcp.f32 %v1890_v28 }
 0xe79   :  { %v3296_v30 = vpop.eup %3295 }
 0xe7a   :  { %v1901_v56 = vmul.f32 %v3296_v30, %v3288_v10 }
 0xe7d   :  { %v3298_v36 = vpop.eup %3297 }
 0xe7e   :  { %v1902_v40 = vmul.f32 %v3298_v36, %v3290_v11 }
 0xedc   :  { %v1893_v29 = vpop.xlane.xlu0 %1892 }
 0xedd   :  { %3299 = vrcp.f32 %v1893_v29 }
 0xee0   :  { %v1896_v31 = vpop.xlane.xlu1 %1895  ;;  %v1906_v35 = vpop.permute.xlu0 %1905 }
 0xee1   :  { %3301 = vrcp.f32 %v1896_v31  ;;  %3162 = vmatpush3.msra.mxu0 %v1906_v35 }
 0xee2   :  { %3164 = vmatmul.mubr.msk.f32.vlgmr.msra.gmra.mxu0 %vm730_vm4, %v1901_v56  ;;  %3171 = vmatprep.subr.mxu0 %v3358_v55  ;;  %v2340_v56 = vrot.slane %v3930_v34, %v3839_v4 }
 0xee3   :  { %3173 = vmatprep.mubr.msk.f32.mxu0 %vm3359_vm2, %v3358_v55 }
 0xee4   :  { %v1982_v37 = vpop.permute.xlu1 %1981 }
 0xee5   :  { %3167 = vmatpush3.msra.mxu1 %v1982_v37 }
 0xee6   :  { %3169 = vmatmul.mubr.msk.f32.vlgmr.msra.gmra.mxu1 %vm730_vm4, %v1902_v40  ;;  %3176 = vmatprep.subr.mxu1 %v3358_v55  ;;  %v2346_v40 = vrot.slane %v3930_v34, %v3842_v5 }
 0xee7   :  { %3178 = vmatprep.mubr.msk.f32.mxu1 %vm3359_vm2, %v3358_v55 }
 0xee8   :  { %v2058_v42 = vpop.permute.xlu1 %2057 }
 0xee9   :  { %3172 = vmatpush3.msra.mxu0 %v2058_v42 }
 0xeea   :  { %v3300_v39 = vpop.eup %3299  ;;  %3181 = vmatprep.subr.mxu0 %v2919_v47 }
 0xeeb   :  { %v1903_v43 = vmul.f32 %v3300_v39, %v3292_v20 }
 0xeec   :  { %v2134_v44 = vpop.permute.xlu1 %2133 }
 0xeed   :  { %3174 = vmatmul.mubr.msk.f32.vlgmr.msra.gmra.mxu0 %vm730_vm4, %v1903_v43  ;;  %3177 = vmatpush3.msra.mxu1 %v2134_v44 }
 0xeee   :  { %v3302_v45 = vpop.eup %3301  ;;  %3182 = vmatpush3.msra.mxu0 %v2919_v47  ;;  %v2935_v47 = vld [vmem:[%s4150_s6 + $0x78] sm:$0xff] }
 0xeef   :  { %v1904_v46 = vmul.f32 %v3302_v45, %v3294_v24  ;;  %3183 = vmatprep.subr.mxu0 %v2918_v48  ;;  %v2923_v24 = vld [vmem:[%s4149_s5 + $0x28] sm:$0xff] }
 0xef0   :  { %3184 = vmatpush3.msra.mxu0 %v2918_v48  ;;  %v2934_v48 = vld [vmem:[%s4150_s6 + $0x70] sm:$0xff] }
 0xef1   :  { %3179 = vmatmul.mubr.msk.f32.vlgmr.msra.gmra.mxu1 %vm730_vm4, %v1904_v46  ;;  %3185 = vmatprep.subr.mxu0 %v2917_v51 }
 0xef2   :  { %3186 = vmatpush3.msra.mxu0 %v2917_v51  ;;  %v2933_v51 = vld [vmem:[%s4150_s6 + $0x68] sm:$0xff] }
 0xef3   :  { %3187 = vmatprep.subr.mxu0 %v2916_v50 }
 0xef4   :  { %3188 = vmatpush3.msra.mxu0 %v2916_v50  ;;  %v2931_v50 = vld [vmem:[%s4150_s6 + $0x58] sm:$0xff] }
 0xef5   :  { %3203 = vmatprep.subr.mxu0 %v2935_v47 }
 0xfa2   :  { %v1977_v54 = vpop.f32.mrf.mxu0 }
 0xfa4   :  { %v3165_v52 = vpop.f32.mrf.mxu0 }
 0xfa5   :  { %v2930_v52 = vld [vmem:[%s4150_s6 + $0x50] sm:$0xff] }
 0xfa6   :  { %v2053_v53 = vpop.f32.mrf.mxu1 }
 0xfa8   :  { %v3170_v57 = vpop.f32.mrf.mxu1 }
 0xfa9   :  { %v2928_v57 = vld [vmem:[%s4150_s6 + $0x40] sm:$0xff] }
 0xfad   :  { %v2129_v58 = vpop.f32.mrf.mxu0 }
 0xfae   :  { %2211 = vrot.lane.b32.xlu0 %v2129_v58, %s3364_s2  ;;  %v2357_v58 = vrot.slane %v3930_v34, %v1224_v22 }
 0xfaf   :  { %v3175_v60 = vpop.f32.mrf.mxu0 }
 0xfb1   :  { %v2205_v0 = vpop.f32.mrf.mxu1 }
 0xfb2   :  { %2213 = vrot.lane.b32.xlu1 %v2205_v0, %s3364_s2 }
 0xfb3   :  { %v3180_v1 = vpop.f32.mrf.mxu1 }
0x1020   :  { %v2212_v2 = vpop.permute.xlu0 %2211 }
0x1021   :  { %v2217_v3 = vsel %vm427_vm3, %v1977_v54, %v2212_v2  ;;  %v2932_v54 = vld [vmem:[%s4150_s6 + $0x60] sm:$0xff] }
0x1022   :  { %3189 = vmatprep.mubr.msk.f32.mxu0 %vm253_vm1, %v2217_v3 }
0x1024   :  { %v2214_v6 = vpop.permute.xlu1 %2213 }
0x1025   :  { %v2218_v59 = vsel %vm427_vm3, %v2053_v53, %v2214_v6  ;;  %v2929_v53 = vld [vmem:[%s4150_s6 + $0x48] sm:$0xff] }
0x1026   :  { %3190 = vmatmul.mubr.msk.f32.vlgmr.msra.gmra.mxu0 %vm253_vm1, %v2218_v59 }
0x1027   :  { %3204 = vmatpush3.msra.mxu0 %v2935_v47 }
0x1028   :  { %3205 = vmatprep.subr.mxu0 %v2934_v48 }
0x1029   :  { %3206 = vmatpush3.msra.mxu0 %v2934_v48 }
0x102a   :  { %3207 = vmatprep.subr.mxu0 %v2933_v51 }
0x102b   :  { %3208 = vmatpush3.msra.mxu0 %v2933_v51 }
0x102c   :  { %3209 = vmatprep.subr.mxu0 %v2932_v54 }
0x102d   :  { %3210 = vmatpush3.msra.mxu0 %v2932_v54  ;;  %v2582_v54 = vrot.slane %v3930_v34, %v1449_v21  ;;  %v2679_v21 = vld [vmem:[%s4154_s10 + $0x10] sm:$0xff] }
0x102e   :  { %3211 = vmatprep.subr.mxu0 %v2931_v50 }
0x102f   :  { %3212 = vmatpush3.msra.mxu0 %v2931_v50 }
0x1030   :  { %3213 = vmatprep.subr.mxu0 %v2930_v52 }
0x1031   :  { %3214 = vmatpush3.msra.mxu0 %v2930_v52 }
0x1032   :  { %3215 = vmatprep.subr.mxu0 %v2929_v53 }
0x1033   :  { %3216 = vmatpush3.msra.mxu0 %v2929_v53  ;;  %v2588_v53 = vrot.slane %v3930_v34, %v1455_v25  ;;  %v2678_v25 = vld [vmem:[%s4154_s10 + $0x8] sm:$0xff] }
0x1034   :  { %3217 = vmatprep.subr.mxu0 %v2928_v57 }
0x1035   :  { %3218 = vmatpush3.msra.mxu0 %v2928_v57 }
0x10e6   :  { %v3191_v62 = vpop.f32.mrf.mxu0 }
0x10e7   :  { %v2306_v63 = vadd.f32 %v3191_v62, %v2227_v61 }
0x10e8   :  { %v2300_v7 = vpop.f32.mrf.mxu0 }
0x10e9   :  { %v2301_v8 = vadd.f32 %v2300_v7, %v2227_v61  ;;  %v2310_v9 = vadd.f32 %v2306_v63, %v3922_v33 }
0x10eb   :  { %v2314_v10 = vsel %vm253_vm1, %v2310_v9, 0.0  ;;  %v2309_v14 = vadd.f32 %v2301_v8, %v3920_v32  ;;  %v2925_v32 = vld [vmem:[%s4149_s5 + $0x38] sm:$0xff] }
0x10ec   :  { %2315 = vadd.xlane.f32.xlu1 %v2314_v10  ;;  %3192 = vmatprep.subr.mxu1 %v2925_v32 }
0x10ed   :  { %v2311_v11 = vsel %vm253_vm1, %v2309_v14, 0.0  ;;  %3193 = vmatpush3.msra.mxu1 %v2925_v32 }
0x10ee   :  { %2312 = vadd.xlane.f32.xlu0 %v2311_v11  ;;  %3194 = vmatprep.subr.mxu1 %v2924_v23 }
0x10ef   :  { %3195 = vmatpush3.msra.mxu1 %v2924_v23 }
0x10f0   :  { %3196 = vmatprep.subr.mxu1 %v2923_v24 }
0x10f1   :  { %3197 = vmatpush3.msra.mxu1 %v2923_v24 }
0x10f2   :  { %3198 = vmatprep.subr.mxu1 %v2922_v26 }
0x10f3   :  { %3199 = vmatpush3.msra.mxu1 %v2922_v26 }
0x10f4   :  { %3222 = vmatprep.subr.mxu1 %v3358_v55 }
0x1175   :  { %v2316_v18 = vpop.xlane.xlu1 %2315 }
0x1176   :  { %v2318_v12 = vmul.f32 0.03125, %v2316_v18 }
0x1177   :  { %v2313_v13 = vpop.xlane.xlu0 %2312 }
0x1178   :  { %v2317_v15 = vmul.f32 0.03125, %v2313_v13  ;;  %v2320_v16 = vsub.f32 %v2310_v9, %v2318_v12 }
0x117a   :  { %v2319_v41 = vsub.f32 %v2309_v14, %v2317_v15  ;;  %v2322_v20 = vmul.f32 %v2320_v16, %v2320_v16 }
0x117c   :  { %v2321_v17 = vmul.f32 %v2319_v41, %v2319_v41  ;;  %v2326_v33 = vsel %vm253_vm1, %v2322_v20, 0.0 }
0x117e   :  { %v2323_v19 = vsel %vm253_vm1, %v2321_v17, 0.0 }
0x117f   :  { %2324 = vadd.xlane.f32.xlu0 %v2323_v19 }
0x1183   :  { %2327 = vadd.xlane.f32.xlu0 %v2326_v33 }
0x1208   :  { %v2325_v27 = vpop.xlane.xlu0 %2324 }
0x1209   :  { %v2329_v28 = vmul.f32 0.03125, %v2325_v27 }
0x120b   :  { %v2331_v29 = vadd.f32 1e-12, %v2329_v28 }
0x120c   :  { %v2328_v30 = vpop.xlane.xlu0 %2327 }
0x120d   :  { %3303 = vrsqrt.f32 %v2331_v29  ;;  %v2330_v31 = vmul.f32 0.03125, %v2328_v30 }
0x120f   :  { %v2332_v35 = vadd.f32 1e-12, %v2330_v31 }
0x1211   :  { %3305 = vrsqrt.f32 %v2332_v35 }
0x121a   :  { %v3304_v36 = vpop.eup %3303 }
0x121b   :  { %v2335_v37 = vmul.f32 %v3304_v36, %v2319_v41  ;;  %v2469_v41 = vrot.slane %v3930_v34, %v1335_v49  ;;  %v2677_v34 = vld [vmem:[%s4154_s10] sm:$0xff] }
0x121d   :  { %v2341_v42 = vmul.f32 %v2340_v56, %v2335_v37 }
0x121e   :  { %v3306_v39 = vpop.eup %3305 }
0x121f   :  { %v2336_v43 = vmul.f32 %v3306_v39, %v2320_v16  ;;  %v4051_v44 = vadd.f32 %v2346_v40, %v2341_v42  ;;  %v2593_v42 = vld [vmem:[%s4153_s9 + $0x10] sm:$0xff]  ;;  %v2592_v39 = vld [vmem:[%s4153_s9 + $0x8] sm:$0xff] }
0x1221   :  { %v2342_v45 = vmul.f32 %v2340_v56, %v2336_v43  ;;  %3200 = vmatprep.mubr.msk.f32.mxu1 %vm253_vm1, %v4051_v44  ;;  %v2591_v43 = vld [vmem:[%s4153_s9] sm:$0xff] }
0x1223   :  { %v2348_v46 = vadd.f32 %v2346_v40, %v2342_v45  ;;  %v2594_v40 = vld [vmem:[%s4153_s9 + $0x18] sm:$0xff] }
0x1225   :  { %3201 = vmatmul.mubr.msk.f32.vlgmr.msra.gmra.mxu1 %vm253_vm1, %v2348_v46 }
0x1226   :  { %3230 = vmatprep.mubr.msk.f32.mxu1 %vm3359_vm2, %v3358_v55  ;;  %3223 = vmatpush3.msra.mxu1 %v2594_v40 }
0x1227   :  { %3224 = vmatprep.subr.mxu1 %v3358_v55 }
0x1228   :  { %3225 = vmatpush3.msra.mxu1 %v2593_v42 }
0x1229   :  { %3226 = vmatprep.subr.mxu1 %v3358_v55 }
0x122a   :  { %3227 = vmatpush3.msra.mxu1 %v2592_v39 }
0x122b   :  { %3228 = vmatprep.subr.mxu1 %v3358_v55 }
0x122c   :  { %3229 = vmatpush3.msra.mxu1 %v2591_v43 }
0x122d   :  { %3233 = vmatprep.subr.mxu1 %v3358_v55 }
0x12e5   :  { %v3202_v60 = vpop.f32.mrf.mxu1 }
0x12e6   :  { %v2436_v0 = vadd.f32 %v3202_v60, %v2357_v58 }
0x12e7   :  { %v2430_v1 = vpop.f32.mrf.mxu1 }
0x12e8   :  { %v2440_v2 = vmul.f32 %v2436_v0, %v2436_v0  ;;  %v2431_v3 = vadd.f32 %v2430_v1, %v2357_v58 }
0x12ea   :  { %v2442_v6 = vmul.f32 %v2440_v2, %v2436_v0  ;;  %v2439_v59 = vmul.f32 %v2431_v3, %v2431_v3 }
0x12ec   :  { %v2444_v61 = vmul.f32 0.044715, %v2442_v6  ;;  %v2441_v62 = vmul.f32 %v2439_v59, %v2431_v3  ;;  %v3317_v59 = vld [vmem:[%s4152_s8] sm:$0xff] }
0x12ee   :  { %v2446_v63 = vadd.f32 %v2444_v61, %v2436_v0  ;;  %v2443_v7 = vmul.f32 0.044715, %v2441_v62  ;;  %v2598_v61 = vrot.slane %v3317_v59, %v3839_v4 }
0x12f0   :  { %v2448_v8 = vmul.f32 0.7978846, %v2446_v63  ;;  %v2445_v9 = vadd.f32 %v2443_v7, %v2431_v3 }
0x12f2   :  { %3307 = vtanh.f32 %v2448_v8  ;;  %v2447_v10 = vmul.f32 0.7978846, %v2445_v9  ;;  %v2684_v9 = vrot.slane %v3317_v59, %v3842_v5 }
0x12f4   :  { %3309 = vtanh.f32 %v2447_v10 }
0x12ff   :  { %v3308_v14 = vpop.eup %3307 }
0x1300   :  { %v2452_v11 = vadd.f32 1.0, %v3308_v14 }
0x1301   :  { %v3310_v18 = vpop.eup %3309 }
0x1302   :  { %v2451_v22 = vadd.f32 1.0, %v3310_v18  ;;  %v2454_v12 = vmul.f32 0.5, %v2452_v11 }
0x1304   :  { %v2453_v13 = vmul.f32 0.5, %v2451_v22  ;;  %v2456_v16 = vmul.f32 %v2454_v12, %v2436_v0 }
0x1306   :  { %v2455_v15 = vmul.f32 %v2453_v13, %v2431_v3 }
0x1308   :  { %3219 = vmatprep.mubr.msk.f32.mxu0 %vm1337_vm5, %v2455_v15 }
0x1309   :  { %3220 = vmatmul.mubr.msk.f32.vlgmr.msra.gmra.mxu0 %vm1337_vm5, %v2456_v16 }
0x13c9   :  { %v3221_v17 = vpop.f32.mrf.mxu0 }
0x13ca   :  { %v2548_v19 = vadd.f32 %v3221_v17, %v2469_v41 }
0x13cb   :  { %v2542_v20 = vpop.f32.mrf.mxu0 }
0x13cc   :  { %v2543_v33 = vadd.f32 %v2542_v20, %v2469_v41  ;;  %v2552_v32 = vadd.f32 %v2548_v19, %v2348_v46 }
0x13ce   :  { %v2556_v23 = vsel %vm253_vm1, %v2552_v32, 0.0  ;;  %v2551_v24 = vadd.f32 %v2543_v33, %v4051_v44 }
0x13cf   :  { %2557 = vadd.xlane.f32.xlu0 %v2556_v23 }
0x13d0   :  { %v2553_v26 = vsel %vm253_vm1, %v2551_v24, 0.0 }
0x13d1   :  { %2554 = vadd.xlane.f32.xlu1 %v2553_v26 }
0x1458   :  { %v2558_v27 = vpop.xlane.xlu0 %2557 }
0x1459   :  { %v2560_v28 = vmul.f32 0.03125, %v2558_v27 }
0x145a   :  { %v2555_v29 = vpop.xlane.xlu1 %2554 }
0x145b   :  { %v2562_v30 = vsub.f32 %v2552_v32, %v2560_v28  ;;  %v2559_v31 = vmul.f32 0.03125, %v2555_v29 }
0x145d   :  { %v2561_v35 = vsub.f32 %v2551_v24, %v2559_v31  ;;  %v2564_v49 = vmul.f32 %v2562_v30, %v2562_v30 }
0x145f   :  { %v2568_v56 = vsel %vm253_vm1, %v2564_v49, 0.0  ;;  %v2563_v36 = vmul.f32 %v2561_v35, %v2561_v35 }
0x1460   :  { %2569 = vadd.xlane.f32.xlu0 %v2568_v56 }
0x1461   :  { %v2565_v37 = vsel %vm253_vm1, %v2563_v36, 0.0 }
0x1462   :  { %2566 = vadd.xlane.f32.xlu1 %v2565_v37 }
0x14e9   :  { %v2570_v44 = vpop.xlane.xlu0 %2569 }
0x14ea   :  { %v2572_v45 = vmul.f32 0.03125, %v2570_v44 }
0x14eb   :  { %v2567_v46 = vpop.xlane.xlu1 %2566 }
0x14ec   :  { %v2574_v47 = vadd.f32 1e-12, %v2572_v45  ;;  %v2571_v48 = vmul.f32 0.03125, %v2567_v46 }
0x14ee   :  { %3311 = vrsqrt.f32 %v2574_v47  ;;  %v2573_v51 = vadd.f32 1e-12, %v2571_v48 }
0x14f0   :  { %3313 = vrsqrt.f32 %v2573_v51 }
0x14fb   :  { %v3312_v50 = vpop.eup %3311 }
0x14fc   :  { %v2578_v52 = vmul.f32 %v3312_v50, %v2562_v30 }
0x14fd   :  { %v3314_v57 = vpop.eup %3313 }
0x14fe   :  { %v2577_v58 = vmul.f32 %v3314_v57, %v2561_v35  ;;  %v2584_v60 = vmul.f32 %v2582_v54, %v2578_v52 }
0x1500   :  { %v2583_v0 = vmul.f32 %v2582_v54, %v2577_v58  ;;  %v2590_v1 = vadd.f32 %v2588_v53, %v2584_v60 }
0x1502   :  { %v2589_v2 = vadd.f32 %v2588_v53, %v2583_v0  ;;  %v2601_v3 = vrot.slane %v2590_v1, 7 }
0x1504   :  { %v2603_v6 = vsel %vm2602_vm6, %v2601_v3, %v2589_v2 }
0x1505   :  { %3231 = vmatmul.mubr.msk.f32.vlgmr.msra.gmra.mxu1 %vm253_vm1, %v2603_v6 }
0x1506   :  { %3241 = vmatprep.mubr.msk.f32.mxu1 %vm3359_vm2, %v3358_v55  ;;  %3234 = vmatpush3.msra.mxu1 %v2680_v38 }
0x1507   :  { %3235 = vmatprep.subr.mxu1 %v3358_v55 }
0x1508   :  { %3236 = vmatpush3.msra.mxu1 %v2679_v21 }
0x1509   :  { %3237 = vmatprep.subr.mxu1 %v3358_v55 }
0x150a   :  { %3238 = vmatpush3.msra.mxu1 %v2678_v25 }
0x150b   :  { %3239 = vmatprep.subr.mxu1 %v3358_v55 }
0x150c   :  { %3240 = vmatpush3.msra.mxu1 %v2677_v34 }
0x15c5   :  { %v2672_v62 = vpop.f32.mrf.mxu1 }
0x15c6   :  { %v2673_v63 = vadd.f32 %v2672_v62, %v2598_v61 }
0x15c7   :  { %v3232_v7 = vpop.f32.mrf.mxu1 }
0x15c8   :  { %3315 = vtanh.f32 %v2673_v63 }
0x15d5   :  { %v3316_v8 = vpop.eup %3315 }
0x15d6   :  { %3242 = vmatmul.mubr.msk.f32.vlgmr.msra.gmra.mxu1 %vm253_vm1, %v3316_v8 }
0x1696   :  { %v2754_v10 = vpop.f32.mrf.mxu1 }
0x1697   :  { %v2755_v14 = vadd.f32 %v2754_v10, %v2684_v9 }
0x1698   :  { %v3243_v55 = vpop.f32.mrf.mxu1 }
0x1699   :  { %v2759_v11 = vsel %vm2758_vm7, %v2755_v14, 0.0 }
0x169a   :  { %2760 = vst [vmem:[%s4155_s11] sm:$0xff] %v2759_v11 }
0x169b   :  { %2765 = vsyncpa [#allocation4], 1 }
0x169c   :  { %2766 = vsyncpa [#allocation5], 1 }

</bundles_post_ra>
